<compile_context>
chip_gen: v7x
topology: tpu7x:2x2x1
jax: 0.10.0
libtpu: 0.0.40
codegen_flags: <defaults>
</compile_context>

<pallas_src>
import jax
import jax.numpy as jnp
from jax import lax
from jax.experimental import pallas as pl
from jax.experimental.pallas import tpu as pltpu


def _round_up(x, m):
    return (x + m - 1) // m * m


def lstm_fc_kernel(x_ref, h0_ref, c0_ref, wih_ref, whh_ref, b_ref,
                   fcw_ref, fcb_ref,
                   logits_ref, hout_ref, cout_ref,
                   hall_sc):
    T, B, _ = x_ref.shape
    Hp = h0_ref.shape[1]

    # Hoist all weights / bias out of the recurrence (loaded once).
    wih = wih_ref[...]            # (Ep, 4*Hp)   bf16
    whh = whh_ref[...]            # (Hp, 4*Hp)   bf16
    b = b_ref[...]                # (1,  4*Hp)   f32  (b_ih + b_hh, gate-padded)

    h = h0_ref[...]               # (B, Hp) f32
    c = c0_ref[...]               # (B, Hp) f32

    # T is small and static: fully unrolled recurrence.
    for t in range(T):
        x_t = x_ref[t]            # (B, Ep) bf16
        z = (jnp.dot(x_t, wih, preferred_element_type=jnp.float32)
             + jnp.dot(h.astype(jnp.bfloat16), whh,
                       preferred_element_type=jnp.float32)
             + b)                 # (B, 4*Hp) f32, gate order [i | f | g | o]
        i_g = jax.nn.sigmoid(z[:, 0 * Hp:1 * Hp])
        f_g = jax.nn.sigmoid(z[:, 1 * Hp:2 * Hp])
        g_g = jnp.tanh(z[:, 2 * Hp:3 * Hp])
        o_g = jax.nn.sigmoid(z[:, 3 * Hp:4 * Hp])
        c = f_g * c + i_g * g_g
        h = o_g * jnp.tanh(c)
        hall_sc[t * B:(t + 1) * B, :] = h      # stash h_t for the batched FC

    # Final state written once (not every step).
    hout_ref[...] = h
    cout_ref[...] = c

    # One FC matmul over all T*B rows, outside the serial recurrence.
    logits = (jnp.dot(hall_sc[...].astype(jnp.bfloat16), fcw_ref[...],
                      preferred_element_type=jnp.float32)
              + fcb_ref[...])                  # (T*B, Vp) f32
    for t in range(T):
        logits_ref[t] = logits[t * B:(t + 1) * B, :]


def model_forward(x_ids, prev_state, params):
    """Mirrors Model.forward(x, prev_state) -> (logits, (h_n, c_n))."""
    emb = params["embedding"]       # (V, Ep)      bf16
    wih = params["wih"]             # (Ep, 4*Hp)   bf16
    whh = params["whh"]             # (Hp, 4*Hp)   bf16
    b = params["b"]                 # (1, 4*Hp)    f32
    fcw = params["fcw"]             # (Hp, Vp)     bf16
    fcb = params["fcb"]             # (1, Vp)      f32
    H, V = params["H"], params["V"]

    Ep = emb.shape[1]
    Hp = whh.shape[0]
    Vp = fcw.shape[1]
    T, B = x_ids.shape

    h0, c0 = prev_state             # (1, B, H) each (num_layers = 1)
    h0 = h0[0]
    c0 = c0[0]
    h0p = jnp.zeros((B, Hp), jnp.float32).at[:, :H].set(h0)
    c0p = jnp.zeros((B, Hp), jnp.float32).at[:, :H].set(c0)

    # Glue: embedding lookup (gather) in plain JAX, already E-padded & bf16.
    x_emb = jnp.take(emb, x_ids, axis=0)        # (T, B, Ep) bf16

    grid_spec = pltpu.PrefetchScalarGridSpec(
        num_scalar_prefetch=0,
        grid=(1,),
        in_specs=[
            pl.BlockSpec((T, B, Ep), lambda i: (0, 0, 0)),     # x_emb (whole)
            pl.BlockSpec((B, Hp), lambda i: (0, 0)),           # h0
            pl.BlockSpec((B, Hp), lambda i: (0, 0)),           # c0
            pl.BlockSpec((Ep, 4 * Hp), lambda i: (0, 0)),      # W_ih fused gates
            pl.BlockSpec((Hp, 4 * Hp), lambda i: (0, 0)),      # W_hh fused gates
            pl.BlockSpec((1, 4 * Hp), lambda i: (0, 0)),       # bias
            pl.BlockSpec((Hp, Vp), lambda i: (0, 0)),          # fc weight
            pl.BlockSpec((1, Vp), lambda i: (0, 0)),           # fc bias
        ],
        out_specs=[
            pl.BlockSpec((T, B, Vp), lambda i: (0, 0, 0)),     # logits (whole)
            pl.BlockSpec((B, Hp), lambda i: (0, 0)),           # final h
            pl.BlockSpec((B, Hp), lambda i: (0, 0)),           # final c
        ],
        scratch_shapes=[
            pltpu.VMEM((T * B, Hp), jnp.float32),              # all h_t, for FC
        ],
    )

    logits_p, h_n, c_n = pl.pallas_call(
        lstm_fc_kernel,
        out_shape=(
            jax.ShapeDtypeStruct((T, B, Vp), jnp.float32),
            jax.ShapeDtypeStruct((B, Hp), jnp.float32),
            jax.ShapeDtypeStruct((B, Hp), jnp.float32),
        ),
        grid_spec=grid_spec,
        compiler_params=pltpu.CompilerParams(
            dimension_semantics=("arbitrary",),
        ),
    )(x_emb, h0p, c0p, wih, whh, b, fcw, fcb)

    # Strip padding back to the logical sizes.
    return logits_p[:, :, :V], (h_n[None, :, :H], c_n[None, :, :H])


def init_params(key, n_vocab, embedding_dim=100, lstm_size=100):
    ks = jax.random.split(key, 7)
    E, H, V = embedding_dim, lstm_size, n_vocab
    scale = 0.1
    emb = jax.random.normal(ks[0], (V, E), jnp.float32) * scale
    # PyTorch layout: weight_ih (4H, E), weight_hh (4H, H), gate order i,f,g,o.
    w_ih = jax.random.normal(ks[1], (4 * H, E), jnp.float32) * scale
    w_hh = jax.random.normal(ks[2], (4 * H, H), jnp.float32) * scale
    b_ih = jax.random.normal(ks[3], (4 * H,), jnp.float32) * scale
    b_hh = jax.random.normal(ks[4], (4 * H,), jnp.float32) * scale
    fc_w = jax.random.normal(ks[5], (V, H), jnp.float32) * scale
    fc_b = jax.random.normal(ks[6], (V,), jnp.float32) * scale

    Ep = _round_up(E, 128)
    Hp = _round_up(H, 128)
    Vp = _round_up(V, 128)

    def pack_gates(w, in_dim, in_dim_p):
        # (4H, in_dim) torch layout -> (in_dim_p, 4*Hp), gate-blocked & zero-padded,
        # pre-transposed so the kernel computes x @ W.
        out = jnp.zeros((in_dim_p, 4 * Hp), jnp.float32)
        for k in range(4):
            out = out.at[:in_dim, k * Hp:k * Hp + H].set(w[k * H:(k + 1) * H, :].T)
        return out

    b_comb = b_ih + b_hh
    b_p = jnp.zeros((1, 4 * Hp), jnp.float32)
    for k in range(4):
        b_p = b_p.at[0, k * Hp:k * Hp + H].set(b_comb[k * H:(k + 1) * H])

    emb_p = jnp.zeros((V, Ep), jnp.float32).at[:, :E].set(emb)
    fcw_p = jnp.zeros((Hp, Vp), jnp.float32).at[:H, :V].set(fc_w.T)
    fcb_p = jnp.zeros((1, Vp), jnp.float32).at[0, :V].set(fc_b)

    params = {
        "embedding": emb_p.astype(jnp.bfloat16),       # (V, Ep)
        "wih": pack_gates(w_ih, E, Ep).astype(jnp.bfloat16),   # (Ep, 4*Hp)
        "whh": pack_gates(w_hh, H, Hp).astype(jnp.bfloat16),   # (Hp, 4*Hp)
        "b": b_p,                                      # (1, 4*Hp) f32
        "fcw": fcw_p.astype(jnp.bfloat16),             # (Hp, Vp)
        "fcb": fcb_p,                                  # (1, Vp)   f32
        "H": H,
        "V": V,
    }
    raw = {"w_ih": w_ih, "w_hh": w_hh, "b_ih": b_ih, "b_hh": b_hh,
           "fc_w": fc_w, "fc_b": fc_b, "emb": emb}
    return params, raw


def reference_forward(x_ids, prev_state, raw):
    """Pure-JAX f32 reference matching torch.nn.LSTM semantics (for validation)."""
    emb = raw["emb"][x_ids]                                     # (T, B, E)
    h, c = prev_state[0][0], prev_state[1][0]
    H = h.shape[1]

    def step(carry, x_t):
        h, c = carry
        z = x_t @ raw["w_ih"].T + raw["b_ih"] + h @ raw["w_hh"].T + raw["b_hh"]
        i = jax.nn.sigmoid(z[:, 0 * H:1 * H])
        f = jax.nn.sigmoid(z[:, 1 * H:2 * H])
        g = jnp.tanh(z[:, 2 * H:3 * H])
        o = jax.nn.sigmoid(z[:, 3 * H:4 * H])
        c_new = f * c + i * g
        h_new = o * jnp.tanh(c_new)
        return (h_new, c_new), h_new

    (h_n, c_n), outs = lax.scan(step, (h, c), emb)
    logits = outs @ raw["fc_w"].T + raw["fc_b"]
    return logits, (h_n[None], c_n[None])


if __name__ == "__main__":
    n_vocab = 150            # synthetic vocabulary size (not a multiple of 128 -> exercises V padding)
    T = 4                    # sequence_length from the module
    B = 8                    # batch size
    H = 100                  # lstm_size / embedding_dim

    key = jax.random.PRNGKey(0)
    k_param, k_x = jax.random.split(key)
    params, raw = init_params(k_param, n_vocab)

    x_ids = jax.random.randint(k_x, (T, B), 0, n_vocab, dtype=jnp.int32)
    # Model.init_state(...) -> zeros (num_layers, batch, lstm_size)
    prev_state = (jnp.zeros((1, B, H), jnp.float32),
                  jnp.zeros((1, B, H), jnp.float32))

    logits, (h_n, c_n) = model_forward(x_ids, prev_state, params)
    jax.block_until_ready(logits)
    jax.block_until_ready(h_n)
    jax.block_until_ready(c_n)

    # Validate against a pure-JAX f32 reference of the PyTorch semantics
    # (bf16 matmul operands -> slightly looser tolerance).
    ref_logits, (ref_h, ref_c) = reference_forward(x_ids, prev_state, raw)
    assert jnp.allclose(logits, ref_logits, atol=2e-2, rtol=2e-2)
    assert jnp.allclose(h_n, ref_h, atol=2e-2, rtol=2e-2)
    assert jnp.allclose(c_n, ref_c, atol=2e-2, rtol=2e-2)

    print("KERNEL_OK")
</pallas_src>

<mosaic_0001>
module attributes {stable_mosaic.version = 11 : i64} {
  func.func @lstm_fc_kernel(%arg0: i32, %arg1: memref<4x8x128xbf16, #tpu.memory_space<vmem>>, %arg2: memref<8x128xf32, #tpu.memory_space<vmem>>, %arg3: memref<8x128xf32, #tpu.memory_space<vmem>>, %arg4: memref<128x512xbf16, #tpu.memory_space<vmem>>, %arg5: memref<128x512xbf16, #tpu.memory_space<vmem>>, %arg6: memref<1x512xf32, #tpu.memory_space<vmem>>, %arg7: memref<128x256xbf16, #tpu.memory_space<vmem>>, %arg8: memref<1x256xf32, #tpu.memory_space<vmem>>, %arg9: memref<4x8x256xf32, #tpu.memory_space<vmem>>, %arg10: memref<8x128xf32, #tpu.memory_space<vmem>>, %arg11: memref<8x128xf32, #tpu.memory_space<vmem>>, %arg12: memref<32x128xf32, #tpu.memory_space<vmem>>) attributes {dimension_semantics = [#tpu.dimension_semantics<arbitrary>], iteration_bounds = array<i64: 1>, scalar_prefetch = 0 : i64, scratch_operands = 1 : i64, tpu.core_type = #tpu.core_type<tc>, window_params = [{pipeline_mode = #tpu.pipeline_mode<synchronous>, transform_indices = @transform_0, window_bounds = array<i64: 4, 8, 128>}, {pipeline_mode = #tpu.pipeline_mode<synchronous>, transform_indices = @transform_1, window_bounds = array<i64: 8, 128>}, {pipeline_mode = #tpu.pipeline_mode<synchronous>, transform_indices = @transform_2, window_bounds = array<i64: 8, 128>}, {pipeline_mode = #tpu.pipeline_mode<synchronous>, transform_indices = @transform_3, window_bounds = array<i64: 128, 512>}, {pipeline_mode = #tpu.pipeline_mode<synchronous>, transform_indices = @transform_4, window_bounds = array<i64: 128, 512>}, {pipeline_mode = #tpu.pipeline_mode<synchronous>, transform_indices = @transform_5, window_bounds = array<i64: 1, 512>}, {pipeline_mode = #tpu.pipeline_mode<synchronous>, transform_indices = @transform_6, window_bounds = array<i64: 128, 256>}, {pipeline_mode = #tpu.pipeline_mode<synchronous>, transform_indices = @transform_7, window_bounds = array<i64: 1, 256>}, {pipeline_mode = #tpu.pipeline_mode<synchronous>, transform_indices = @transform_8, window_bounds = array<i64: 4, 8, 256>}, {pipeline_mode = #tpu.pipeline_mode<synchronous>, transform_indices = @transform_9, window_bounds = array<i64: 8, 128>}, {pipeline_mode = #tpu.pipeline_mode<synchronous>, transform_indices = @transform_10, window_bounds = array<i64: 8, 128>}]} {
    %c0 = arith.constant 0 : index
    %c0_0 = arith.constant 0 : index
    %0 = vector.load %arg4[%c0, %c0_0] : memref<128x512xbf16, #tpu.memory_space<vmem>>, vector<128x512xbf16>
    %c0_1 = arith.constant 0 : index
    %c0_2 = arith.constant 0 : index
    %1 = vector.load %arg5[%c0_1, %c0_2] : memref<128x512xbf16, #tpu.memory_space<vmem>>, vector<128x512xbf16>
    %c0_3 = arith.constant 0 : index
    %c0_4 = arith.constant 0 : index
    %2 = vector.load %arg6[%c0_3, %c0_4] : memref<1x512xf32, #tpu.memory_space<vmem>>, vector<1x512xf32>
    %c0_5 = arith.constant 0 : index
    %c0_6 = arith.constant 0 : index
    %3 = vector.load %arg2[%c0_5, %c0_6] : memref<8x128xf32, #tpu.memory_space<vmem>>, vector<8x128xf32>
    %c0_7 = arith.constant 0 : index
    %c0_8 = arith.constant 0 : index
    %4 = vector.load %arg3[%c0_7, %c0_8] : memref<8x128xf32, #tpu.memory_space<vmem>>, vector<8x128xf32>
    %c0_9 = arith.constant 0 : index
    %c0_10 = arith.constant 0 : index
    %c0_11 = arith.constant 0 : index
    %5 = vector.load %arg1[%c0_9, %c0_10, %c0_11] : memref<4x8x128xbf16, #tpu.memory_space<vmem>>, vector<1x8x128xbf16>
    %6 = vector.shape_cast %5 : vector<1x8x128xbf16> to vector<8x128xbf16>
    %cst = arith.constant dense<0.000000e+00> : vector<8x512xf32>
    %7 = tpu.matmul %6, %0, %cst {dimension_numbers = #tpu.dot_dimension_numbers<[1], [0], [0], [1], [0, 0, 1, 1], [], []>} : vector<8x128xbf16>, vector<128x512xbf16>, vector<8x512xf32> -> vector<8x512xf32>
    %8 = arith.truncf %3 : vector<8x128xf32> to vector<8x128xbf16>
    %cst_12 = arith.constant dense<0.000000e+00> : vector<8x512xf32>
    %9 = tpu.matmul %8, %1, %cst_12 {dimension_numbers = #tpu.dot_dimension_numbers<[1], [0], [0], [1], [0, 0, 1, 1], [], []>} : vector<8x128xbf16>, vector<128x512xbf16>, vector<8x512xf32> -> vector<8x512xf32>
    %10 = arith.addf %7, %9 : vector<8x512xf32>
    %11 = vector.broadcast %2 : vector<1x512xf32> to vector<8x512xf32>
    %12 = arith.addf %10, %11 : vector<8x512xf32>
    %13 = vector.extract_strided_slice %12 {offsets = [0, 0], sizes = [8, 128], strides = [1, 1]} : vector<8x512xf32> to vector<8x128xf32>
    %14 = arith.negf %13 : vector<8x128xf32>
    %15 = math.exp %14 : vector<8x128xf32>
    %cst_13 = arith.constant 1.000000e+00 : f32
    %16 = vector.broadcast %cst_13 : f32 to vector<8x128xf32>
    %17 = arith.addf %16, %15 : vector<8x128xf32>
    %18 = arith.divf %16, %17 : vector<8x128xf32>
    %19 = vector.extract_strided_slice %12 {offsets = [0, 128], sizes = [8, 128], strides = [1, 1]} : vector<8x512xf32> to vector<8x128xf32>
    %20 = arith.negf %19 : vector<8x128xf32>
    %21 = math.exp %20 : vector<8x128xf32>
    %cst_14 = arith.constant 1.000000e+00 : f32
    %22 = vector.broadcast %cst_14 : f32 to vector<8x128xf32>
    %23 = arith.addf %22, %21 : vector<8x128xf32>
    %24 = arith.divf %22, %23 : vector<8x128xf32>
    %25 = vector.extract_strided_slice %12 {offsets = [0, 256], sizes = [8, 128], strides = [1, 1]} : vector<8x512xf32> to vector<8x128xf32>
    %26 = math.tanh %25 : vector<8x128xf32>
    %27 = vector.extract_strided_slice %12 {offsets = [0, 384], sizes = [8, 128], strides = [1, 1]} : vector<8x512xf32> to vector<8x128xf32>
    %28 = arith.negf %27 : vector<8x128xf32>
    %29 = math.exp %28 : vector<8x128xf32>
    %cst_15 = arith.constant 1.000000e+00 : f32
    %30 = vector.broadcast %cst_15 : f32 to vector<8x128xf32>
    %31 = arith.addf %30, %29 : vector<8x128xf32>
    %32 = arith.divf %30, %31 : vector<8x128xf32>
    %33 = arith.mulf %24, %4 : vector<8x128xf32>
    %34 = arith.mulf %18, %26 : vector<8x128xf32>
    %35 = arith.addf %33, %34 : vector<8x128xf32>
    %36 = math.tanh %35 : vector<8x128xf32>
    %37 = arith.mulf %32, %36 : vector<8x128xf32>
    %c0_16 = arith.constant 0 : index
    %c0_17 = arith.constant 0 : index
    %38 = vector.load %arg12[%c0_16, %c0_17] : memref<32x128xf32, #tpu.memory_space<vmem>>, vector<8x128xf32>
    tpu.vector_store %arg12[%c0_16, %c0_17], %37 {strides = array<i32>} : memref<32x128xf32, #tpu.memory_space<vmem>>, vector<8x128xf32>,
    %c1 = arith.constant 1 : index
    %c0_18 = arith.constant 0 : index
    %c0_19 = arith.constant 0 : index
    %39 = vector.load %arg1[%c1, %c0_18, %c0_19] : memref<4x8x128xbf16, #tpu.memory_space<vmem>>, vector<1x8x128xbf16>
    %40 = vector.shape_cast %39 : vector<1x8x128xbf16> to vector<8x128xbf16>
    %cst_20 = arith.constant dense<0.000000e+00> : vector<8x512xf32>
    %41 = tpu.matmul %40, %0, %cst_20 {dimension_numbers = #tpu.dot_dimension_numbers<[1], [0], [0], [1], [0, 0, 1, 1], [], []>} : vector<8x128xbf16>, vector<128x512xbf16>, vector<8x512xf32> -> vector<8x512xf32>
    %42 = arith.truncf %37 : vector<8x128xf32> to vector<8x128xbf16>
    %cst_21 = arith.constant dense<0.000000e+00> : vector<8x512xf32>
    %43 = tpu.matmul %42, %1, %cst_21 {dimension_numbers = #tpu.dot_dimension_numbers<[1], [0], [0], [1], [0, 0, 1, 1], [], []>} : vector<8x128xbf16>, vector<128x512xbf16>, vector<8x512xf32> -> vector<8x512xf32>
    %44 = arith.addf %41, %43 : vector<8x512xf32>
    %45 = vector.broadcast %2 : vector<1x512xf32> to vector<8x512xf32>
    %46 = arith.addf %44, %45 : vector<8x512xf32>
    %47 = vector.extract_strided_slice %46 {offsets = [0, 0], sizes = [8, 128], strides = [1, 1]} : vector<8x512xf32> to vector<8x128xf32>
    %48 = arith.negf %47 : vector<8x128xf32>
    %49 = math.exp %48 : vector<8x128xf32>
    %cst_22 = arith.constant 1.000000e+00 : f32
    %50 = vector.broadcast %cst_22 : f32 to vector<8x128xf32>
    %51 = arith.addf %50, %49 : vector<8x128xf32>
    %52 = arith.divf %50, %51 : vector<8x128xf32>
    %53 = vector.extract_strided_slice %46 {offsets = [0, 128], sizes = [8, 128], strides = [1, 1]} : vector<8x512xf32> to vector<8x128xf32>
    %54 = arith.negf %53 : vector<8x128xf32>
    %55 = math.exp %54 : vector<8x128xf32>
    %cst_23 = arith.constant 1.000000e+00 : f32
    %56 = vector.broadcast %cst_23 : f32 to vector<8x128xf32>
    %57 = arith.addf %56, %55 : vector<8x128xf32>
    %58 = arith.divf %56, %57 : vector<8x128xf32>
    %59 = vector.extract_strided_slice %46 {offsets = [0, 256], sizes = [8, 128], strides = [1, 1]} : vector<8x512xf32> to vector<8x128xf32>
    %60 = math.tanh %59 : vector<8x128xf32>
    %61 = vector.extract_strided_slice %46 {offsets = [0, 384], sizes = [8, 128], strides = [1, 1]} : vector<8x512xf32> to vector<8x128xf32>
    %62 = arith.negf %61 : vector<8x128xf32>
    %63 = math.exp %62 : vector<8x128xf32>
    %cst_24 = arith.constant 1.000000e+00 : f32
    %64 = vector.broadcast %cst_24 : f32 to vector<8x128xf32>
    %65 = arith.addf %64, %63 : vector<8x128xf32>
    %66 = arith.divf %64, %65 : vector<8x128xf32>
    %67 = arith.mulf %58, %35 : vector<8x128xf32>
    %68 = arith.mulf %52, %60 : vector<8x128xf32>
    %69 = arith.addf %67, %68 : vector<8x128xf32>
    %70 = math.tanh %69 : vector<8x128xf32>
    %71 = arith.mulf %66, %70 : vector<8x128xf32>
    %c8 = arith.constant 8 : index
    %c0_25 = arith.constant 0 : index
    %72 = vector.load %arg12[%c8, %c0_25] : memref<32x128xf32, #tpu.memory_space<vmem>>, vector<8x128xf32>
    tpu.vector_store %arg12[%c8, %c0_25], %71 {strides = array<i32>} : memref<32x128xf32, #tpu.memory_space<vmem>>, vector<8x128xf32>,
    %c2 = arith.constant 2 : index
    %c0_26 = arith.constant 0 : index
    %c0_27 = arith.constant 0 : index
    %73 = vector.load %arg1[%c2, %c0_26, %c0_27] : memref<4x8x128xbf16, #tpu.memory_space<vmem>>, vector<1x8x128xbf16>
    %74 = vector.shape_cast %73 : vector<1x8x128xbf16> to vector<8x128xbf16>
    %cst_28 = arith.constant dense<0.000000e+00> : vector<8x512xf32>
    %75 = tpu.matmul %74, %0, %cst_28 {dimension_numbers = #tpu.dot_dimension_numbers<[1], [0], [0], [1], [0, 0, 1, 1], [], []>} : vector<8x128xbf16>, vector<128x512xbf16>, vector<8x512xf32> -> vector<8x512xf32>
    %76 = arith.truncf %71 : vector<8x128xf32> to vector<8x128xbf16>
    %cst_29 = arith.constant dense<0.000000e+00> : vector<8x512xf32>
    %77 = tpu.matmul %76, %1, %cst_29 {dimension_numbers = #tpu.dot_dimension_numbers<[1], [0], [0], [1], [0, 0, 1, 1], [], []>} : vector<8x128xbf16>, vector<128x512xbf16>, vector<8x512xf32> -> vector<8x512xf32>
    %78 = arith.addf %75, %77 : vector<8x512xf32>
    %79 = vector.broadcast %2 : vector<1x512xf32> to vector<8x512xf32>
    %80 = arith.addf %78, %79 : vector<8x512xf32>
    %81 = vector.extract_strided_slice %80 {offsets = [0, 0], sizes = [8, 128], strides = [1, 1]} : vector<8x512xf32> to vector<8x128xf32>
    %82 = arith.negf %81 : vector<8x128xf32>
    %83 = math.exp %82 : vector<8x128xf32>
    %cst_30 = arith.constant 1.000000e+00 : f32
    %84 = vector.broadcast %cst_30 : f32 to vector<8x128xf32>
    %85 = arith.addf %84, %83 : vector<8x128xf32>
    %86 = arith.divf %84, %85 : vector<8x128xf32>
    %87 = vector.extract_strided_slice %80 {offsets = [0, 128], sizes = [8, 128], strides = [1, 1]} : vector<8x512xf32> to vector<8x128xf32>
    %88 = arith.negf %87 : vector<8x128xf32>
    %89 = math.exp %88 : vector<8x128xf32>
    %cst_31 = arith.constant 1.000000e+00 : f32
    %90 = vector.broadcast %cst_31 : f32 to vector<8x128xf32>
    %91 = arith.addf %90, %89 : vector<8x128xf32>
    %92 = arith.divf %90, %91 : vector<8x128xf32>
    %93 = vector.extract_strided_slice %80 {offsets = [0, 256], sizes = [8, 128], strides = [1, 1]} : vector<8x512xf32> to vector<8x128xf32>
    %94 = math.tanh %93 : vector<8x128xf32>
    %95 = vector.extract_strided_slice %80 {offsets = [0, 384], sizes = [8, 128], strides = [1, 1]} : vector<8x512xf32> to vector<8x128xf32>
    %96 = arith.negf %95 : vector<8x128xf32>
    %97 = math.exp %96 : vector<8x128xf32>
    %cst_32 = arith.constant 1.000000e+00 : f32
    %98 = vector.broadcast %cst_32 : f32 to vector<8x128xf32>
    %99 = arith.addf %98, %97 : vector<8x128xf32>
    %100 = arith.divf %98, %99 : vector<8x128xf32>
    %101 = arith.mulf %92, %69 : vector<8x128xf32>
    %102 = arith.mulf %86, %94 : vector<8x128xf32>
    %103 = arith.addf %101, %102 : vector<8x128xf32>
    %104 = math.tanh %103 : vector<8x128xf32>
    %105 = arith.mulf %100, %104 : vector<8x128xf32>
    %c16 = arith.constant 16 : index
    %c0_33 = arith.constant 0 : index
    %106 = vector.load %arg12[%c16, %c0_33] : memref<32x128xf32, #tpu.memory_space<vmem>>, vector<8x128xf32>
    tpu.vector_store %arg12[%c16, %c0_33], %105 {strides = array<i32>} : memref<32x128xf32, #tpu.memory_space<vmem>>, vector<8x128xf32>,
    %c3 = arith.constant 3 : index
    %c0_34 = arith.constant 0 : index
    %c0_35 = arith.constant 0 : index
    %107 = vector.load %arg1[%c3, %c0_34, %c0_35] : memref<4x8x128xbf16, #tpu.memory_space<vmem>>, vector<1x8x128xbf16>
    %108 = vector.shape_cast %107 : vector<1x8x128xbf16> to vector<8x128xbf16>
    %cst_36 = arith.constant dense<0.000000e+00> : vector<8x512xf32>
    %109 = tpu.matmul %108, %0, %cst_36 {dimension_numbers = #tpu.dot_dimension_numbers<[1], [0], [0], [1], [0, 0, 1, 1], [], []>} : vector<8x128xbf16>, vector<128x512xbf16>, vector<8x512xf32> -> vector<8x512xf32>
    %110 = arith.truncf %105 : vector<8x128xf32> to vector<8x128xbf16>
    %cst_37 = arith.constant dense<0.000000e+00> : vector<8x512xf32>
    %111 = tpu.matmul %110, %1, %cst_37 {dimension_numbers = #tpu.dot_dimension_numbers<[1], [0], [0], [1], [0, 0, 1, 1], [], []>} : vector<8x128xbf16>, vector<128x512xbf16>, vector<8x512xf32> -> vector<8x512xf32>
    %112 = arith.addf %109, %111 : vector<8x512xf32>
    %113 = vector.broadcast %2 : vector<1x512xf32> to vector<8x512xf32>
    %114 = arith.addf %112, %113 : vector<8x512xf32>
    %115 = vector.extract_strided_slice %114 {offsets = [0, 0], sizes = [8, 128], strides = [1, 1]} : vector<8x512xf32> to vector<8x128xf32>
    %116 = arith.negf %115 : vector<8x128xf32>
    %117 = math.exp %116 : vector<8x128xf32>
    %cst_38 = arith.constant 1.000000e+00 : f32
    %118 = vector.broadcast %cst_38 : f32 to vector<8x128xf32>
    %119 = arith.addf %118, %117 : vector<8x128xf32>
    %120 = arith.divf %118, %119 : vector<8x128xf32>
    %121 = vector.extract_strided_slice %114 {offsets = [0, 128], sizes = [8, 128], strides = [1, 1]} : vector<8x512xf32> to vector<8x128xf32>
    %122 = arith.negf %121 : vector<8x128xf32>
    %123 = math.exp %122 : vector<8x128xf32>
    %cst_39 = arith.constant 1.000000e+00 : f32
    %124 = vector.broadcast %cst_39 : f32 to vector<8x128xf32>
    %125 = arith.addf %124, %123 : vector<8x128xf32>
    %126 = arith.divf %124, %125 : vector<8x128xf32>
    %127 = vector.extract_strided_slice %114 {offsets = [0, 256], sizes = [8, 128], strides = [1, 1]} : vector<8x512xf32> to vector<8x128xf32>
    %128 = math.tanh %127 : vector<8x128xf32>
    %129 = vector.extract_strided_slice %114 {offsets = [0, 384], sizes = [8, 128], strides = [1, 1]} : vector<8x512xf32> to vector<8x128xf32>
    %130 = arith.negf %129 : vector<8x128xf32>
    %131 = math.exp %130 : vector<8x128xf32>
    %cst_40 = arith.constant 1.000000e+00 : f32
    %132 = vector.broadcast %cst_40 : f32 to vector<8x128xf32>
    %133 = arith.addf %132, %131 : vector<8x128xf32>
    %134 = arith.divf %132, %133 : vector<8x128xf32>
    %135 = arith.mulf %126, %103 : vector<8x128xf32>
    %136 = arith.mulf %120, %128 : vector<8x128xf32>
    %137 = arith.addf %135, %136 : vector<8x128xf32>
    %138 = math.tanh %137 : vector<8x128xf32>
    %139 = arith.mulf %134, %138 : vector<8x128xf32>
    %c24 = arith.constant 24 : index
    %c0_41 = arith.constant 0 : index
    %140 = vector.load %arg12[%c24, %c0_41] : memref<32x128xf32, #tpu.memory_space<vmem>>, vector<8x128xf32>
    tpu.vector_store %arg12[%c24, %c0_41], %139 {strides = array<i32>} : memref<32x128xf32, #tpu.memory_space<vmem>>, vector<8x128xf32>,
    %c0_42 = arith.constant 0 : index
    %c0_43 = arith.constant 0 : index
    %141 = vector.load %arg10[%c0_42, %c0_43] : memref<8x128xf32, #tpu.memory_space<vmem>>, vector<8x128xf32>
    tpu.vector_store %arg10[%c0_42, %c0_43], %139 {strides = array<i32>} : memref<8x128xf32, #tpu.memory_space<vmem>>, vector<8x128xf32>,
    %c0_44 = arith.constant 0 : index
    %c0_45 = arith.constant 0 : index
    %142 = vector.load %arg11[%c0_44, %c0_45] : memref<8x128xf32, #tpu.memory_space<vmem>>, vector<8x128xf32>
    tpu.vector_store %arg11[%c0_44, %c0_45], %137 {strides = array<i32>} : memref<8x128xf32, #tpu.memory_space<vmem>>, vector<8x128xf32>,
    %c0_46 = arith.constant 0 : index
    %c0_47 = arith.constant 0 : index
    %143 = vector.load %arg12[%c0_46, %c0_47] : memref<32x128xf32, #tpu.memory_space<vmem>>, vector<32x128xf32>
    %144 = arith.truncf %143 : vector<32x128xf32> to vector<32x128xbf16>
    %c0_48 = arith.constant 0 : index
    %c0_49 = arith.constant 0 : index
    %145 = vector.load %arg7[%c0_48, %c0_49] : memref<128x256xbf16, #tpu.memory_space<vmem>>, vector<128x256xbf16>
    %cst_50 = arith.constant dense<0.000000e+00> : vector<32x256xf32>
    %146 = tpu.matmul %144, %145, %cst_50 {dimension_numbers = #tpu.dot_dimension_numbers<[1], [0], [0], [1], [0, 0, 1, 1], [], []>} : vector<32x128xbf16>, vector<128x256xbf16>, vector<32x256xf32> -> vector<32x256xf32>
    %c0_51 = arith.constant 0 : index
    %c0_52 = arith.constant 0 : index
    %147 = vector.load %arg8[%c0_51, %c0_52] : memref<1x256xf32, #tpu.memory_space<vmem>>, vector<1x256xf32>
    %148 = vector.broadcast %147 : vector<1x256xf32> to vector<32x256xf32>
    %149 = arith.addf %146, %148 : vector<32x256xf32>
    %150 = vector.extract_strided_slice %149 {offsets = [0, 0], sizes = [8, 256], strides = [1, 1]} : vector<32x256xf32> to vector<8x256xf32>
    %c0_53 = arith.constant 0 : index
    %c0_54 = arith.constant 0 : index
    %c0_55 = arith.constant 0 : index
    %151 = vector.load %arg9[%c0_53, %c0_54, %c0_55] : memref<4x8x256xf32, #tpu.memory_space<vmem>>, vector<1x8x256xf32>
    %152 = vector.shape_cast %151 : vector<1x8x256xf32> to vector<8x256xf32>
    %153 = vector.shape_cast %150 : vector<8x256xf32> to vector<1x8x256xf32>
    tpu.vector_store %arg9[%c0_53, %c0_54, %c0_55], %153 {strides = array<i32>} : memref<4x8x256xf32, #tpu.memory_space<vmem>>, vector<1x8x256xf32>,
    %154 = vector.extract_strided_slice %149 {offsets = [8, 0], sizes = [8, 256], strides = [1, 1]} : vector<32x256xf32> to vector<8x256xf32>
    %c1_56 = arith.constant 1 : index
    %c0_57 = arith.constant 0 : index
    %c0_58 = arith.constant 0 : index
    %155 = vector.load %arg9[%c1_56, %c0_57, %c0_58] : memref<4x8x256xf32, #tpu.memory_space<vmem>>, vector<1x8x256xf32>
    %156 = vector.shape_cast %155 : vector<1x8x256xf32> to vector<8x256xf32>
    %157 = vector.shape_cast %154 : vector<8x256xf32> to vector<1x8x256xf32>
    tpu.vector_store %arg9[%c1_56, %c0_57, %c0_58], %157 {strides = array<i32>} : memref<4x8x256xf32, #tpu.memory_space<vmem>>, vector<1x8x256xf32>,
    %158 = vector.extract_strided_slice %149 {offsets = [16, 0], sizes = [8, 256], strides = [1, 1]} : vector<32x256xf32> to vector<8x256xf32>
    %c2_59 = arith.constant 2 : index
    %c0_60 = arith.constant 0 : index
    %c0_61 = arith.constant 0 : index
    %159 = vector.load %arg9[%c2_59, %c0_60, %c0_61] : memref<4x8x256xf32, #tpu.memory_space<vmem>>, vector<1x8x256xf32>
    %160 = vector.shape_cast %159 : vector<1x8x256xf32> to vector<8x256xf32>
    %161 = vector.shape_cast %158 : vector<8x256xf32> to vector<1x8x256xf32>
    tpu.vector_store %arg9[%c2_59, %c0_60, %c0_61], %161 {strides = array<i32>} : memref<4x8x256xf32, #tpu.memory_space<vmem>>, vector<1x8x256xf32>,
    %162 = vector.extract_strided_slice %149 {offsets = [24, 0], sizes = [8, 256], strides = [1, 1]} : vector<32x256xf32> to vector<8x256xf32>
    %c3_62 = arith.constant 3 : index
    %c0_63 = arith.constant 0 : index
    %c0_64 = arith.constant 0 : index
    %163 = vector.load %arg9[%c3_62, %c0_63, %c0_64] : memref<4x8x256xf32, #tpu.memory_space<vmem>>, vector<1x8x256xf32>
    %164 = vector.shape_cast %163 : vector<1x8x256xf32> to vector<8x256xf32>
    %165 = vector.shape_cast %162 : vector<8x256xf32> to vector<1x8x256xf32>
    tpu.vector_store %arg9[%c3_62, %c0_63, %c0_64], %165 {strides = array<i32>} : memref<4x8x256xf32, #tpu.memory_space<vmem>>, vector<1x8x256xf32>,
    return
  }
  func.func @transform_0(%arg0: i32) -> (i32, i32, i32) {
    %c0_i32 = arith.constant 0 : i32
    %c0_i32_0 = arith.constant 0 : i32
    %c0_i32_1 = arith.constant 0 : i32
    %c0_i32_2 = arith.constant 0 : i32
    return %c0_i32, %c0_i32_0, %c0_i32_1 : i32, i32, i32
  }
  func.func @transform_1(%arg0: i32) -> (i32, i32) {
    %c0_i32 = arith.constant 0 : i32
    %c0_i32_0 = arith.constant 0 : i32
    %c0_i32_1 = arith.constant 0 : i32
    return %c0_i32, %c0_i32_0 : i32, i32
  }
  func.func @transform_2(%arg0: i32) -> (i32, i32) {
    %c0_i32 = arith.constant 0 : i32
    %c0_i32_0 = arith.constant 0 : i32
    %c0_i32_1 = arith.constant 0 : i32
    return %c0_i32, %c0_i32_0 : i32, i32
  }
  func.func @transform_3(%arg0: i32) -> (i32, i32) {
    %c0_i32 = arith.constant 0 : i32
    %c0_i32_0 = arith.constant 0 : i32
    %c0_i32_1 = arith.constant 0 : i32
    return %c0_i32, %c0_i32_0 : i32, i32
  }
  func.func @transform_4(%arg0: i32) -> (i32, i32) {
    %c0_i32 = arith.constant 0 : i32
    %c0_i32_0 = arith.constant 0 : i32
    %c0_i32_1 = arith.constant 0 : i32
    return %c0_i32, %c0_i32_0 : i32, i32
  }
  func.func @transform_5(%arg0: i32) -> (i32, i32) {
    %c0_i32 = arith.constant 0 : i32
    %c0_i32_0 = arith.constant 0 : i32
    %c0_i32_1 = arith.constant 0 : i32
    return %c0_i32, %c0_i32_0 : i32, i32
  }
  func.func @transform_6(%arg0: i32) -> (i32, i32) {
    %c0_i32 = arith.constant 0 : i32
    %c0_i32_0 = arith.constant 0 : i32
    %c0_i32_1 = arith.constant 0 : i32
    return %c0_i32, %c0_i32_0 : i32, i32
  }
  func.func @transform_7(%arg0: i32) -> (i32, i32) {
    %c0_i32 = arith.constant 0 : i32
    %c0_i32_0 = arith.constant 0 : i32
    %c0_i32_1 = arith.constant 0 : i32
    return %c0_i32, %c0_i32_0 : i32, i32
  }
  func.func @transform_8(%arg0: i32) -> (i32, i32, i32) {
    %c0_i32 = arith.constant 0 : i32
    %c0_i32_0 = arith.constant 0 : i32
    %c0_i32_1 = arith.constant 0 : i32
    %c0_i32_2 = arith.constant 0 : i32
    return %c0_i32, %c0_i32_0, %c0_i32_1 : i32, i32, i32
  }
  func.func @transform_9(%arg0: i32) -> (i32, i32) {
    %c0_i32 = arith.constant 0 : i32
    %c0_i32_0 = arith.constant 0 : i32
    %c0_i32_1 = arith.constant 0 : i32
    return %c0_i32, %c0_i32_0 : i32, i32
  }
  func.func @transform_10(%arg0: i32) -> (i32, i32) {
    %c0_i32 = arith.constant 0 : i32
    %c0_i32_0 = arith.constant 0 : i32
    %c0_i32_1 = arith.constant 0 : i32
    return %c0_i32, %c0_i32_0 : i32, i32
  }
}

</mosaic_0001>

<bundles_post_ra>
// kernel: tpu_custom_call.1
= control target key start
LH: loop header
LB: loop body
LE: loop exit
PB: predicated region body
PF: predicated region fallthrough
CT: control target
= control target key end

     0   :  { %16 = vsyncpa [#allocation4], 0  ;;  %s2717_s0 = inlined_call_operand.hbm [shape: bf16[4,8,128], index: 0, kind: input, shape index: {}]   ;;  %s2718_s1 = inlined_call_operand.hbm [shape: f32[8,128], index: 1, kind: input, shape index: {}]   ;;  %s2719_s2 = inlined_call_operand.hbm [shape: f32[8,128], index: 2, kind: input, shape index: {}]   ;;  %s2720_s3 = inlined_call_operand.hbm [shape: bf16[128,512], index: 3, kind: input, shape index: {}]   ;;  %s2721_s4 = inlined_call_operand.hbm [shape: bf16[128,512], index: 4, kind: input, shape index: {}]   ;;  %s2722_s5 = inlined_call_operand.vmem [shape: f32[1,512], index: 5, kind: input, shape index: {}]   ;;  %s2723_s6 = inlined_call_operand.hbm [shape: bf16[128,256], index: 6, kind: input, shape index: {}]   ;;  %s2724_s7 = inlined_call_operand.vmem [shape: f32[1,256], index: 7, kind: input, shape index: {}]   ;;  %s2725_s8 = inlined_call_operand.hbm [shape: f32[4,8,256], index: 8, kind: output, shape index: {0}]   ;;  %s2726_s9 = inlined_call_operand.hbm [shape: f32[8,128], index: 9, kind: output, shape index: {1}]   ;;  %s2727_s10 = inlined_call_operand.hbm [shape: f32[8,128], index: 10, kind: output, shape index: {2}]  }
   0x1   :  { %17 = vsyncpa [#allocation7], 0 }
   0x2   :  { %18 = vsyncpa [#allocation10], 0 }
   0x3   :  { %19 = vsyncpa [#allocation13], 0 }
   0x4   :  { %20 = vsyncpa [#allocation5], 0 }
   0x5   :  { %21 = vsyncpa [#allocation16], 0  ;;  %s2044_s13 = smov [#allocation6]   ;;  %s2045_s15 = smov [#allocation9]  }
   0x6   :  { %s40_s14 = sshll.u32 %s2044_s13, 4  ;;  %s59_s16 = sshll.u32 %s2045_s15, 4  ;;  %s41_s14 = int_to_ptr.vmem [resolvable:$true] %s40_s14  ;;  %s2115_s16 = int_to_ptr.vmem [resolvable:$true] %s59_s16 }
   0x7   :  { %s1834_s19 = scalar_lea.hbm %s2718_s1, 128 }
   0x8   :  { %p1835_p0 = scmp.ne.s32.totalorder %s2718_s1, %s1834_s19  ;;  %p1838_p1 = scmp.lt.u32.totalorder %s1834_s19, %s2718_s1 }
   0xa   :  { %p1840_p2 = pnand %p1838_p1, %p1835_p0 }
   0xc   :  { %1843 = shalt.err (!%p1840_p2)
}
   0xd   :  { %s1844_s24 = scalar_lea.vmem %s41_s14, 128  ;;  %p1849_p4 = scmp.lt.s32.totalorder %s41_s14, %s41_s14 }
   0xe   :  { %p1845_p3 = scmp.ne.s32.totalorder %s41_s14, %s1844_s24  ;;  %p1850_p5 = scmp.lt.s32.totalorder %s1844_s24, %s1844_s24 }
  0x10   :  { %p1851_p6 = por %p1850_p5, %p1849_p4 }
  0x12   :  { %p1852_p7 = pnand %p1851_p6, %p1845_p3 }
  0x14   :  { %1855 = shalt.err (!%p1852_p7)
}
  0x15   :  { %43 = dma.hbm_to_vmem [thread:$0]  %s2718_s1, 128, %s41_s14, [#allocation7]  }
  0x16   :  { %s1856_s29 = scalar_lea.hbm %s2720_s3, 4096 }
  0x17   :  { %p1857_p8 = scmp.ne.s32.totalorder %s2720_s3, %s1856_s29  ;;  %p1860_p9 = scmp.lt.u32.totalorder %s1856_s29, %s2720_s3 }
  0x19   :  { %p1862_p10 = pnand %p1860_p9, %p1857_p8 }
  0x1b   :  { %1865 = shalt.err (!%p1862_p10)
}
  0x1c   :  { %s1866_s15 = scalar_lea.vmem %s2115_s16, 4096  ;;  %p1871_p12 = scmp.lt.s32.totalorder %s2115_s16, %s2115_s16 }
  0x1d   :  { %p1867_p11 = scmp.ne.s32.totalorder %s2115_s16, %s1866_s15  ;;  %p1872_p13 = scmp.lt.s32.totalorder %s1866_s15, %s1866_s15 }
  0x1f   :  { %p1873_p0 = por %p1872_p13, %p1871_p12 }
  0x21   :  { %p1874_p1 = pnand %p1873_p0, %p1867_p11 }
  0x23   :  { %1877 = shalt.err (!%p1874_p1)
}
  0x24   :  { %s2046_s1 = smov 256   ;;  %s2047_s14 = smov 16  }
  0x25   :  { %65 = dma.hbm_to_vmem [thread:$0]  %s2720_s3, 4096, %s2115_s16, [#allocation10], %s2046_s1, %s2046_s1, %s2047_s14  }
  0x26   :  { %s2048_s19 = smov [#allocation3]   ;;  %s1878_s23 = scalar_lea.hbm %s2717_s0, 256 }
  0x27   :  { %s27_s20 = sshll.u32 %s2048_s19, 4  ;;  %p1879_p2 = scmp.ne.s32.totalorder %s2717_s0, %s1878_s23  ;;  %s28_s20 = int_to_ptr.vmem [resolvable:$true] %s27_s20 }
  0x28   :  { %p1882_p3 = scmp.lt.u32.totalorder %s1878_s23, %s2717_s0 }
  0x2a   :  { %p1884_p4 = pnand %p1882_p3, %p1879_p2 }
  0x2c   :  { %1887 = shalt.err (!%p1884_p4)
}
  0x2d   :  { %s1888_s28 = scalar_lea.vmem %s28_s20, 256  ;;  %p1893_p6 = scmp.lt.s32.totalorder %s28_s20, %s28_s20 }
  0x2e   :  { %p1889_p5 = scmp.ne.s32.totalorder %s28_s20, %s1888_s28  ;;  %p1894_p7 = scmp.lt.s32.totalorder %s1888_s28, %s1888_s28 }
  0x30   :  { %p1895_p8 = por %p1894_p7, %p1893_p6 }
  0x32   :  { %p1896_p9 = pnand %p1895_p8, %p1889_p5 }
  0x34   :  { %1899 = shalt.err (!%p1896_p9)
}
  0x35   :  { %s2049_s3 = smov 64   ;;  %s2050_s16 = smov 4  }
  0x36   :  { %33 = dma.hbm_to_vmem [thread:$0]  %s2717_s0, 256, %s28_s20, [#allocation4], %s2049_s3, %s2049_s3, %s2050_s16  }
  0x37   :  { %s2051_s11 = smov [#allocation8]   ;;  %s2052_s13 = smov [#allocation11]  }
  0x38   :  { %s50_s12 = sshll.u32 %s2051_s11, 4  ;;  %s71_s15 = sshll.u32 %s2052_s13, 4  ;;  %s51_s12 = int_to_ptr.vmem [resolvable:$true] %s50_s12  ;;  %s72_s15 = int_to_ptr.vmem [resolvable:$true] %s71_s15 }
  0x39   :  { %s1900_s19 = scalar_lea.hbm %s2719_s2, 128 }
  0x3a   :  { %p1901_p10 = scmp.ne.s32.totalorder %s2719_s2, %s1900_s19  ;;  %p1904_p11 = scmp.lt.u32.totalorder %s1900_s19, %s2719_s2 }
  0x3c   :  { %p1906_p12 = pnand %p1904_p11, %p1901_p10 }
  0x3e   :  { %1909 = shalt.err (!%p1906_p12)
}
  0x3f   :  { %s1910_s0 = scalar_lea.vmem %s51_s12, 128  ;;  %p1915_p0 = scmp.lt.s32.totalorder %s51_s12, %s51_s12 }
  0x40   :  { %p1911_p13 = scmp.ne.s32.totalorder %s51_s12, %s1910_s0  ;;  %p1916_p1 = scmp.lt.s32.totalorder %s1910_s0, %s1910_s0 }
  0x42   :  { %p1917_p2 = por %p1916_p1, %p1915_p0 }
  0x44   :  { %p1918_p3 = pnand %p1917_p2, %p1911_p13 }
  0x46   :  { %1921 = shalt.err (!%p1918_p3)
}
  0x47   :  { %53 = dma.hbm_to_vmem [thread:$0]  %s2719_s2, 128, %s51_s12, [#allocation7]  }
  0x48   :  { %s1922_s28 = scalar_lea.hbm %s2721_s4, 4096 }
  0x49   :  { %p1923_p4 = scmp.ne.s32.totalorder %s2721_s4, %s1922_s28  ;;  %p1926_p5 = scmp.lt.u32.totalorder %s1922_s28, %s2721_s4 }
  0x4b   :  { %p1928_p6 = pnand %p1926_p5, %p1923_p4 }
  0x4d   :  { %1931 = shalt.err (!%p1928_p6)
}
  0x4e   :  { %s1932_s11 = scalar_lea.vmem %s72_s15, 4096  ;;  %p1937_p8 = scmp.lt.s32.totalorder %s72_s15, %s72_s15 }
  0x4f   :  { %p1933_p7 = scmp.ne.s32.totalorder %s72_s15, %s1932_s11  ;;  %p1938_p9 = scmp.lt.s32.totalorder %s1932_s11, %s1932_s11 }
  0x51   :  { %p1939_p10 = por %p1938_p9, %p1937_p8 }
  0x53   :  { %p1940_p11 = pnand %p1939_p10, %p1933_p7 }
  0x55   :  { %1943 = shalt.err (!%p1940_p11)
}
  0x56   :  { %77 = dma.hbm_to_vmem [thread:$0]  %s2721_s4, 4096, %s72_s15, [#allocation10], %s2046_s1, %s2046_s1, %s2047_s14  }
  0x57   :  { %s2053_s13 = smov [#allocation12]   ;;  %s1944_s21 = scalar_lea.hbm %s2723_s6, 2048 }
  0x58   :  { %s85_s17 = sshll.u32 %s2053_s13, 4  ;;  %p1945_p12 = scmp.ne.s32.totalorder %s2723_s6, %s1944_s21  ;;  %s86_s17 = int_to_ptr.vmem [resolvable:$true] %s85_s17 }
  0x59   :  { %p1948_p13 = scmp.lt.u32.totalorder %s1944_s21, %s2723_s6 }
  0x5b   :  { %p1950_p0 = pnand %p1948_p13, %p1945_p12 }
  0x5d   :  { %1953 = shalt.err (!%p1950_p0)
}
  0x5e   :  { %s1954_s20 = scalar_lea.vmem %s86_s17, 2048  ;;  %p1959_p2 = scmp.lt.s32.totalorder %s86_s17, %s86_s17 }
  0x5f   :  { %p1955_p1 = scmp.ne.s32.totalorder %s86_s17, %s1954_s20  ;;  %p1960_p3 = scmp.lt.s32.totalorder %s1954_s20, %s1954_s20 }
  0x61   :  { %p1961_p4 = por %p1960_p3, %p1959_p2 }
  0x63   :  { %p1962_p5 = pnand %p1961_p4, %p1955_p1 }
  0x65   :  { %1965 = shalt.err (!%p1962_p5)
}
  0x66   :  { %s2054_s4 = smov 128   ;;  %s2055_s15 = smov 8  }
  0x67   :  { %91 = dma.hbm_to_vmem [thread:$0]  %s2723_s6, 2048, %s86_s17, [#allocation13], %s2054_s4, %s2054_s4, %s2055_s15  }
  0x68   :  { %2032 = dma.done.wait [#allocation4], 256  }
  0x69   :  { %2033 = vsyncadd [#allocation4], 4294967040 }
  0x6a   :  { %2034 = dma.done.wait [#allocation7], 256  }
  0x6b   :  { %2035 = vsyncadd [#allocation7], 4294967040 }
  0x6c   :  { %2036 = dma.done.wait [#allocation10], 8192  }
  0x6d   :  { %2037 = vsyncadd [#allocation10], 4294959104 }
  0x6e   :  { %2038 = dma.done.wait [#allocation13], 2048  }
  0x6f   :  { %2039 = vsyncadd [#allocation13], 4294965248  ;;  %v2728_v0 = vmov 0   ;;  %v2202_v1 = vld [vmem:[#allocation11 + $0x4] ss:$16 sps:$4 sm:$0xff]  }
  0x70   :  { %374 = vmatprep.mubr.bf16.mxu1 %v2728_v0  ;;  %616 = vmatprep.mubr.bf16.mxu0 %v2728_v0  ;;  %v2204_v2 = vld [vmem:[#allocation9 + $0x4] ss:$16 sps:$4 sm:$0xff]   ;;  %v2207_v3 = vld [vmem:[#allocation11] ss:$16 sps:$4 sm:$0xff]   ;;  %v2296_v34 = vld [vmem:[#allocation11 + $0xc] ss:$16 sps:$4 sm:$0xff]  }
  0x71   :  { %2789 = vst [vmem:[#allocation24_spill] sm:$0xff] %v2204_v2  ;;  %342 = vmatprep.subr.bf16.mxu1 %v2202_v1  ;;  %v2209_v4 = vld [vmem:[#allocation9] ss:$16 sps:$4 sm:$0xff]   ;;  %584 = vmatprep.subr.bf16.mxu0 %v2204_v2  ;;  %v2212_v5 = vld [vmem:[#allocation11 + $0x24] ss:$16 sps:$4 sm:$0xff]  }
  0x72   :  { %343 = vmatpush1.bf16.msra.mxu1 %v2207_v3  ;;  %585 = vmatpush1.bf16.msra.mxu0 %v2209_v4  ;;  %v2216_v6 = vld [vmem:[#allocation9 + $0x24] ss:$16 sps:$4 sm:$0xff]   ;;  %v2218_v7 = vld [vmem:[#allocation11 + $0x20] ss:$16 sps:$4 sm:$0xff]   ;;  %v2302_v37 = vld [vmem:[#allocation11 + $0x8] ss:$16 sps:$4 sm:$0xff]  }
  0x73   :  { %2790 = vst [vmem:[#allocation25_spill] sm:$0xff] %v2218_v7  ;;  %344 = vmatprep.subr.bf16.mxu1 %v2212_v5  ;;  %v2221_v8 = vld [vmem:[#allocation9 + $0x20] ss:$16 sps:$4 sm:$0xff]   ;;  %586 = vmatprep.subr.bf16.mxu0 %v2216_v6  ;;  %v2224_v9 = vld [vmem:[#allocation11 + $0x44] ss:$16 sps:$4 sm:$0xff]  }
  0x74   :  { %2791 = vst [vmem:[#allocation26_spill] sm:$0xff] %v2224_v9  ;;  %v2226_v10 = vld [vmem:[#allocation9 + $0x44] ss:$16 sps:$4 sm:$0xff]   ;;  %v2228_v11 = vld [vmem:[#allocation11 + $0x40] ss:$16 sps:$4 sm:$0xff]  }
  0x75   :  { %2792 = vst [vmem:[#allocation27_spill] sm:$0xff] %v2228_v11  ;;  %v2230_v12 = vld [vmem:[#allocation9 + $0x40] ss:$16 sps:$4 sm:$0xff]   ;;  %v2234_v13 = vld [vmem:[#allocation11 + $0x64] ss:$16 sps:$4 sm:$0xff]  }
  0x76   :  { %345 = vmatpush1.bf16.msra.mxu1 %v2218_v7  ;;  %587 = vmatpush1.bf16.msra.mxu0 %v2221_v8  ;;  %2793 = vst [vmem:[#allocation28_spill] sm:$0xff] %v2234_v13  ;;  %v2238_v14 = vld [vmem:[#allocation9 + $0x64] ss:$16 sps:$4 sm:$0xff]   ;;  %v2240_v15 = vld [vmem:[#allocation11 + $0x60] ss:$16 sps:$4 sm:$0xff]  }
  0x77   :  { %346 = vmatprep.subr.bf16.mxu1 %v2224_v9  ;;  %588 = vmatprep.subr.bf16.mxu0 %v2226_v10  ;;  %2794 = vst [vmem:[#allocation29_spill] sm:$0xff] %v2240_v15  ;;  %v2244_v16 = vld [vmem:[#allocation9 + $0x60] ss:$16 sps:$4 sm:$0xff]   ;;  %v2246_v17 = vld [vmem:[#allocation11 + $0x84] ss:$16 sps:$4 sm:$0xff]  }
  0x78   :  { %2795 = vst [vmem:[#allocation30_spill] sm:$0xff] %v2246_v17  ;;  %v2250_v18 = vld [vmem:[#allocation9 + $0x84] ss:$16 sps:$4 sm:$0xff]   ;;  %v2252_v19 = vld [vmem:[#allocation11 + $0x80] ss:$16 sps:$4 sm:$0xff]  }
  0x79   :  { %2796 = vst [vmem:[#allocation31_spill] sm:$0xff] %v2252_v19  ;;  %v2254_v20 = vld [vmem:[#allocation9 + $0x80] ss:$16 sps:$4 sm:$0xff]   ;;  %v2258_v21 = vld [vmem:[#allocation11 + $0xa4] ss:$16 sps:$4 sm:$0xff]  }
  0x7a   :  { %347 = vmatpush1.bf16.msra.mxu1 %v2228_v11  ;;  %589 = vmatpush1.bf16.msra.mxu0 %v2230_v12  ;;  %2797 = vst [vmem:[#allocation32_spill] sm:$0xff] %v2258_v21  ;;  %v2262_v22 = vld [vmem:[#allocation9 + $0xa4] ss:$16 sps:$4 sm:$0xff]   ;;  %v2266_v23 = vld [vmem:[#allocation11 + $0xa0] ss:$16 sps:$4 sm:$0xff]  }
  0x7b   :  { %348 = vmatprep.subr.bf16.mxu1 %v2234_v13  ;;  %590 = vmatprep.subr.bf16.mxu0 %v2238_v14  ;;  %2798 = vst [vmem:[#allocation33_spill] sm:$0xff] %v2266_v23  ;;  %v2268_v24 = vld [vmem:[#allocation9 + $0xa0] ss:$16 sps:$4 sm:$0xff]   ;;  %v2272_v25 = vld [vmem:[#allocation11 + $0xc4] ss:$16 sps:$4 sm:$0xff]  }
  0x7c   :  { %2799 = vst [vmem:[#allocation34_spill] sm:$0xff] %v2272_v25  ;;  %v2274_v26 = vld [vmem:[#allocation9 + $0xc4] ss:$16 sps:$4 sm:$0xff]   ;;  %v2278_v27 = vld [vmem:[#allocation11 + $0xc0] ss:$16 sps:$4 sm:$0xff]  }
  0x7d   :  { %2800 = vst [vmem:[#allocation35_spill] sm:$0xff] %v2278_v27  ;;  %v2280_v28 = vld [vmem:[#allocation9 + $0xc0] ss:$16 sps:$4 sm:$0xff]   ;;  %v2284_v29 = vld [vmem:[#allocation11 + $0xe4] ss:$16 sps:$4 sm:$0xff]  }
  0x7e   :  { %349 = vmatpush1.bf16.msra.mxu1 %v2240_v15  ;;  %591 = vmatpush1.bf16.msra.mxu0 %v2244_v16  ;;  %2801 = vst [vmem:[#allocation36_spill] sm:$0xff] %v2284_v29  ;;  %v2286_v30 = vld [vmem:[#allocation9 + $0xe4] ss:$16 sps:$4 sm:$0xff]   ;;  %v2288_v31 = vld [vmem:[#allocation11 + $0xe0] ss:$16 sps:$4 sm:$0xff]  }
  0x7f   :  { %350 = vmatprep.subr.bf16.mxu1 %v2246_v17  ;;  %592 = vmatprep.subr.bf16.mxu0 %v2250_v18  ;;  %2802 = vst [vmem:[#allocation37_spill] sm:$0xff] %v2288_v31  ;;  %v2292_v32 = vld [vmem:[#allocation9 + $0xe0] ss:$16 sps:$4 sm:$0xff]   ;;  %v2305_v38 = vld [vmem:[#allocation11 + $0x2c] ss:$16 sps:$4 sm:$0xff]  }
  0x80   :  { %v178_v33 = vld [vmem:[#allocation6] sm:$0xff]  ;;  %v2300_v36 = vld [vmem:[#allocation3] sm:$0xf]  ;;  %v2310_v39 = vld [vmem:[#allocation11 + $0x28] ss:$16 sps:$4 sm:$0xff]  }
  0x81   :  { %v181_v35 = vpack.c.bf16 %v178_v33, %v178_v33  ;;  %2803 = vst [vmem:[#allocation38_spill] sm:$0xff] %v2310_v39  ;;  %v2314_v40 = vld [vmem:[#allocation11 + $0x4c] ss:$16 sps:$4 sm:$0xff]   ;;  %v2320_v41 = vld [vmem:[#allocation11 + $0x48] ss:$16 sps:$4 sm:$0xff]  }
  0x82   :  { %351 = vmatpush1.bf16.msra.mxu1 %v2252_v19  ;;  %593 = vmatpush1.bf16.msra.mxu0 %v2254_v20  ;;  %2804 = vst [vmem:[#allocation39_spill] sm:$0xff] %v2314_v40  ;;  %2805 = vst [vmem:[#allocation40_spill] sm:$0xff] %v2320_v41  ;;  %v2323_v42 = vld [vmem:[#allocation11 + $0x6c] ss:$16 sps:$4 sm:$0xff]   ;;  %v2326_v43 = vld [vmem:[#allocation11 + $0x68] ss:$16 sps:$4 sm:$0xff]  }
  0x83   :  { %352 = vmatprep.subr.bf16.mxu1 %v2258_v21  ;;  %594 = vmatprep.subr.bf16.mxu0 %v2262_v22  ;;  %2806 = vst [vmem:[#allocation41_spill] sm:$0xff] %v2323_v42  ;;  %2807 = vst [vmem:[#allocation42_spill] sm:$0xff] %v2326_v43  ;;  %v2329_v44 = vld [vmem:[#allocation11 + $0x8c] ss:$16 sps:$4 sm:$0xff]   ;;  %v2336_v45 = vld [vmem:[#allocation11 + $0x88] ss:$16 sps:$4 sm:$0xff]  }
  0x84   :  { %2808 = vst [vmem:[#allocation43_spill] sm:$0xff] %v2329_v44  ;;  %2809 = vst [vmem:[#allocation44_spill] sm:$0xff] %v2336_v45  ;;  %v2339_v46 = vld [vmem:[#allocation11 + $0xac] ss:$16 sps:$4 sm:$0xff]   ;;  %v2344_v47 = vld [vmem:[#allocation11 + $0xa8] ss:$16 sps:$4 sm:$0xff]  }
  0x85   :  { %2810 = vst [vmem:[#allocation45_spill] sm:$0xff] %v2339_v46  ;;  %2811 = vst [vmem:[#allocation46_spill] sm:$0xff] %v2344_v47  ;;  %v2347_v48 = vld [vmem:[#allocation11 + $0xcc] ss:$16 sps:$4 sm:$0xff]   ;;  %v2352_v49 = vld [vmem:[#allocation11 + $0xc8] ss:$16 sps:$4 sm:$0xff]  }
  0x86   :  { %353 = vmatpush1.bf16.msra.mxu1 %v2266_v23  ;;  %595 = vmatpush1.bf16.msra.mxu0 %v2268_v24  ;;  %2812 = vst [vmem:[#allocation47_spill] sm:$0xff] %v2347_v48  ;;  %2813 = vst [vmem:[#allocation48_spill] sm:$0xff] %v2352_v49  ;;  %v2355_v50 = vld [vmem:[#allocation11 + $0xec] ss:$16 sps:$4 sm:$0xff]   ;;  %v2360_v51 = vld [vmem:[#allocation11 + $0xe8] ss:$16 sps:$4 sm:$0xff]  }
  0x87   :  { %354 = vmatprep.subr.bf16.mxu1 %v2272_v25  ;;  %596 = vmatprep.subr.bf16.mxu0 %v2274_v26  ;;  %2814 = vst [vmem:[#allocation49_spill] sm:$0xff] %v2355_v50  ;;  %2815 = vst [vmem:[#allocation50_spill] sm:$0xff] %v2360_v51  ;;  %v2363_v52 = vld [vmem:[#allocation9 + $0xc] ss:$16 sps:$4 sm:$0xff]   ;;  %v2368_v53 = vld [vmem:[#allocation9 + $0x8] ss:$16 sps:$4 sm:$0xff]  }
  0x88   :  { %2816 = vst [vmem:[#allocation51_spill] sm:$0xff] %v2363_v52  ;;  %v2371_v54 = vld [vmem:[#allocation9 + $0x2c] ss:$16 sps:$4 sm:$0xff]   ;;  %v2376_v55 = vld [vmem:[#allocation9 + $0x28] ss:$16 sps:$4 sm:$0xff]  }
  0x89   :  { %v2380_v56 = vld [vmem:[#allocation9 + $0x4c] ss:$16 sps:$4 sm:$0xff]   ;;  %v2383_v57 = vld [vmem:[#allocation9 + $0x48] ss:$16 sps:$4 sm:$0xff]  }
  0x8a   :  { %355 = vmatpush1.bf16.msra.mxu1 %v2278_v27  ;;  %597 = vmatpush1.bf16.msra.mxu0 %v2280_v28  ;;  %v2386_v58 = vld [vmem:[#allocation9 + $0x6c] ss:$16 sps:$4 sm:$0xff]   ;;  %v2389_v59 = vld [vmem:[#allocation9 + $0x68] ss:$16 sps:$4 sm:$0xff]  }
  0x8b   :  { %356 = vmatprep.subr.bf16.mxu1 %v2284_v29  ;;  %598 = vmatprep.subr.bf16.mxu0 %v2286_v30  ;;  %v2392_v60 = vld [vmem:[#allocation9 + $0x8c] ss:$16 sps:$4 sm:$0xff]   ;;  %v2395_v61 = vld [vmem:[#allocation9 + $0x88] ss:$16 sps:$4 sm:$0xff]  }
  0x8c   :  { %v2398_v62 = vld [vmem:[#allocation9 + $0xac] ss:$16 sps:$4 sm:$0xff]   ;;  %v2401_v63 = vld [vmem:[#allocation9 + $0xa8] ss:$16 sps:$4 sm:$0xff]  }
  0x8d   :  { %v2404_v33 = vld [vmem:[#allocation9 + $0xcc] ss:$16 sps:$4 sm:$0xff]  }
  0x8e   :  { %357 = vmatpush1.bf16.msra.mxu1 %v2288_v31  ;;  %599 = vmatpush1.bf16.msra.mxu0 %v2292_v32 }
  0x8f   :  { %383 = vmatprep.subr.bf16.mxu1 %v2296_v34  ;;  %719 = vmatprep.subr.bf16.mxu0 %v2202_v1 }
  0x91   :  { %375 = vmatmul.mubr.bf16.vlgmr.msra.gmra.mrb[0].mxu1 %v181_v35  ;;  %617 = vmatmul.mubr.bf16.vlgmr.msra.gmra.mrb[0].mxu0 %v2300_v36 }
  0x92   :  { %384 = vmatpush1.bf16.msra.mxu1 %v2302_v37  ;;  %415 = vmatprep.mubr.bf16.mxu1 %v2728_v0 }
  0x93   :  { %385 = vmatprep.subr.bf16.mxu1 %v2305_v38  ;;  %720 = vmatpush1.bf16.msra.mxu0 %v2207_v3 }
  0x94   :  { %721 = vmatprep.subr.bf16.mxu0 %v2212_v5  ;;  %751 = vmatprep.mubr.bf16.mxu0 %v2728_v0 }
  0x96   :  { %386 = vmatpush1.bf16.msra.mxu1 %v2310_v39 }
  0x97   :  { %387 = vmatprep.subr.bf16.mxu1 %v2314_v40  ;;  %722 = vmatpush1.bf16.msra.mxu0 %v2218_v7 }
  0x98   :  { %723 = vmatprep.subr.bf16.mxu0 %v2224_v9 }
  0x9a   :  { %388 = vmatpush1.bf16.msra.mxu1 %v2320_v41 }
  0x9b   :  { %389 = vmatprep.subr.bf16.mxu1 %v2323_v42  ;;  %724 = vmatpush1.bf16.msra.mxu0 %v2228_v11 }
  0x9c   :  { %725 = vmatprep.subr.bf16.mxu0 %v2234_v13 }
  0x9e   :  { %390 = vmatpush1.bf16.msra.mxu1 %v2326_v43 }
  0x9f   :  { %391 = vmatprep.subr.bf16.mxu1 %v2329_v44  ;;  %726 = vmatpush1.bf16.msra.mxu0 %v2240_v15 }
  0xa0   :  { %727 = vmatprep.subr.bf16.mxu0 %v2246_v17 }
  0xa2   :  { %392 = vmatpush1.bf16.msra.mxu1 %v2336_v45 }
  0xa3   :  { %393 = vmatprep.subr.bf16.mxu1 %v2339_v46  ;;  %728 = vmatpush1.bf16.msra.mxu0 %v2252_v19 }
  0xa4   :  { %729 = vmatprep.subr.bf16.mxu0 %v2258_v21 }
  0xa6   :  { %394 = vmatpush1.bf16.msra.mxu1 %v2344_v47 }
  0xa7   :  { %395 = vmatprep.subr.bf16.mxu1 %v2347_v48  ;;  %730 = vmatpush1.bf16.msra.mxu0 %v2266_v23 }
  0xa8   :  { %731 = vmatprep.subr.bf16.mxu0 %v2272_v25 }
  0xaa   :  { %396 = vmatpush1.bf16.msra.mxu1 %v2352_v49 }
  0xab   :  { %397 = vmatprep.subr.bf16.mxu1 %v2355_v50  ;;  %732 = vmatpush1.bf16.msra.mxu0 %v2278_v27 }
  0xac   :  { %733 = vmatprep.subr.bf16.mxu0 %v2284_v29 }
  0xae   :  { %398 = vmatpush1.bf16.msra.mxu1 %v2360_v51 }
  0xaf   :  { %625 = vmatprep.subr.bf16.mxu1 %v2363_v52  ;;  %734 = vmatpush1.bf16.msra.mxu0 %v2288_v31  ;;  %v2817_v31 = vmov 0  }
  0xb0   :  { %801 = vmatprep.subr.bf16.mxu0 %v2204_v2  ;;  %v2413_v2 = vld [vmem:[#allocation9 + $0xe8] ss:$16 sps:$4 sm:$0xff]  }
  0xb1   :  { %416 = vmatmul.mubr.bf16.vlgmr.msra.gmra.mrb[4].mxu1 %v181_v35  ;;  %v2407_v35 = vld [vmem:[#allocation9 + $0xc8] ss:$16 sps:$4 sm:$0xff]  }
  0xb2   :  { %626 = vmatpush1.bf16.msra.mxu1 %v2368_v53  ;;  %657 = vmatprep.mubr.bf16.mxu1 %v2728_v0  ;;  %v2410_v0 = vld [vmem:[#allocation9 + $0xec] ss:$16 sps:$4 sm:$0xff]  }
  0xb3   :  { %627 = vmatprep.subr.bf16.mxu1 %v2371_v54 }
  0xb6   :  { %628 = vmatpush1.bf16.msra.mxu1 %v2376_v55 }
  0xb7   :  { %629 = vmatprep.subr.bf16.mxu1 %v2380_v56 }
  0xba   :  { %630 = vmatpush1.bf16.msra.mxu1 %v2383_v57 }
  0xbb   :  { %631 = vmatprep.subr.bf16.mxu1 %v2386_v58 }
  0xbe   :  { %632 = vmatpush1.bf16.msra.mxu1 %v2389_v59 }
  0xbf   :  { %633 = vmatprep.subr.bf16.mxu1 %v2392_v60 }
  0xc2   :  { %634 = vmatpush1.bf16.msra.mxu1 %v2395_v61 }
  0xc3   :  { %635 = vmatprep.subr.bf16.mxu1 %v2398_v62 }
  0xc6   :  { %636 = vmatpush1.bf16.msra.mxu1 %v2401_v63 }
  0xc7   :  { %637 = vmatprep.subr.bf16.mxu1 %v2404_v33 }
  0xca   :  { %638 = vmatpush1.bf16.msra.mxu1 %v2407_v35 }
  0xcb   :  { %639 = vmatprep.subr.bf16.mxu1 %v2410_v0 }
  0xce   :  { %640 = vmatpush1.bf16.msra.mxu1 %v2413_v2 }
  0xcf   :  { %760 = vmatprep.subr.bf16.mxu1 %v2296_v34 }
  0xd1   :  { %658 = vmatmul.mubr.bf16.vlgmr.msra.gmra.mrb[8].mxu1 %v2300_v36 }
  0xd2   :  { %761 = vmatpush1.bf16.msra.mxu1 %v2302_v37  ;;  %792 = vmatprep.mubr.bf16.mxu1 %v2817_v31 }
  0xd3   :  { %762 = vmatprep.subr.bf16.mxu1 %v2305_v38 }
  0xd6   :  { %763 = vmatpush1.bf16.msra.mxu1 %v2310_v39 }
  0xd7   :  { %764 = vmatprep.subr.bf16.mxu1 %v2314_v40 }
  0xda   :  { %765 = vmatpush1.bf16.msra.mxu1 %v2320_v41 }
  0xdb   :  { %766 = vmatprep.subr.bf16.mxu1 %v2323_v42 }
  0xde   :  { %767 = vmatpush1.bf16.msra.mxu1 %v2326_v43 }
  0xdf   :  { %768 = vmatprep.subr.bf16.mxu1 %v2329_v44  ;;  %v667_v44 = vlaneseq }
  0xe2   :  { %769 = vmatpush1.bf16.msra.mxu1 %v2336_v45 }
  0xe3   :  { %770 = vmatprep.subr.bf16.mxu1 %v2339_v46 }
  0xe6   :  { %771 = vmatpush1.bf16.msra.mxu1 %v2344_v47 }
  0xe7   :  { %772 = vmatprep.subr.bf16.mxu1 %v2347_v48  ;;  %v2436_v48 = vshrl.u32 %v667_v44, 7 }
  0xe9   :  { %2818 = vst [vmem:[#allocation52_spill] sm:$0xff] %v2436_v48 }
  0xea   :  { %773 = vmatpush1.bf16.msra.mxu1 %v2352_v49 }
  0xeb   :  { %774 = vmatprep.subr.bf16.mxu1 %v2355_v50  ;;  %v2768_v50 = vsub.s32 1, %v2436_v48 }
  0xee   :  { %775 = vmatpush1.bf16.msra.mxu1 %v2360_v51 }
  0xef   :  { %842 = vmatprep.subr.bf16.mxu1 %v2363_v52  ;;  %v177_v52 = vld [vmem:[%s2722_s5] sm:$0xf] }
 0x164   :  { %v376_v36 = vpop.f32.mrb[0].mxu1  ;;  %v618_v29 = vpop.f32.mrb[0].mxu0 }
 0x165   :  { %v619_v27 = vadd.f32 %v618_v29, %v376_v36  ;;  %v378_v25 = vpop.f32.mrb[1].mxu1  ;;  %v620_v23 = vpop.f32.mrb[1].mxu0  ;;  %v2773_v29 = vsub.s32 0, %v2436_v48 }
 0x166   :  { %v621_v21 = vadd.f32 %v620_v23, %v378_v25  ;;  %v380_v45 = vpop.f32.mrb[2].mxu1  ;;  %v622_v46 = vpop.f32.mrb[2].mxu0  ;;  %v2445_v23 = vrot.slane %v177_v52, %v2768_v50 }
 0x167   :  { %v381_v19 = vpop.f32.mrb[3].mxu1  ;;  %v623_v47 = vpop.f32.mrb[3].mxu0 }
 0x168   :  { %2819 = vst [vmem:[#allocation53_spill] sm:$0xff] %v2445_v23  ;;  %v2449_v19 = vrot.slane %v177_v52, %v2773_v29  ;;  %v688_v25 = vadd.f32 %v2445_v23, %v621_v21  ;;  %v677_v47 = vsub.s32 2, %v2436_v48 }
 0x16a   :  { %2820 = vst [vmem:[#allocation54_spill] sm:$0xff] %v2449_v19  ;;  %v687_v44 = vadd.f32 %v2449_v19, %v619_v27  ;;  %v1596_v45 = vmul.f32 -1.442695, %v688_v25  ;;  %v2455_v15 = vrot.slane %v177_v52, %v677_v47 }
 0x16c   :  { %v1595_v46 = vmul.f32 -1.442695, %v687_v44  ;;  %1759 = vpow2.f32 %v1596_v45 }
 0x16e   :  { %1761 = vpow2.f32 %v1595_v46 }
 0x184   :  { %v417_v49 = vpop.f32.mrb[4].mxu1 }
 0x185   :  { %v419_v17 = vpop.f32.mrb[5].mxu1 }
 0x186   :  { %v421_v51 = vpop.f32.mrb[6].mxu1 }
 0x187   :  { %v422_v36 = vpop.f32.mrb[7].mxu1  ;;  %v1760_v51 = vpop.eup %1759 }
 0x188   :  { %v681_v36 = vsub.s32 3, %v2436_v48  ;;  %v1762_v43 = vpop.eup %1761  ;;  %v700_v50 = vadd.f32 1.0, %v1760_v51  ;;  %v179_v51 = vld [vmem:[#allocation8] sm:$0xff] }
 0x189   :  { %v694_v42 = vadd.f32 1.0, %v1762_v43 }
 0x18a   :  { %v2457_v13 = vrot.slane %v177_v52, %v681_v36  ;;  %1763 = vrcp.f32 %v700_v50 }
 0x18b   :  { %1765 = vrcp.f32 %v694_v42 }
 0x194   :  { %v1764_v47 = vpop.eup %1763 }
 0x195   :  { %v1766_v43 = vpop.eup %1765  ;;  %v710_v52 = vmul.f32 %v1764_v47, %v179_v51  ;;  %v2828_v47 = vld [vmem:[#allocation31_spill] sm:$0xff]  ;;  %v2829_v51 = vld [vmem:[#allocation44_spill] sm:$0xff] }
 0x1a4   :  { %v659_v29 = vpop.f32.mrb[8].mxu1 }
 0x1a5   :  { %v660_v21 = vadd.f32 %v659_v29, %v417_v49  ;;  %v661_v23 = vpop.f32.mrb[9].mxu1 }
 0x1a6   :  { %v662_v27 = vadd.f32 %v661_v23, %v419_v17  ;;  %v663_v25 = vpop.f32.mrb[10].mxu1 }
 0x1a7   :  { %v689_v44 = vadd.f32 %v2455_v15, %v660_v21  ;;  %v664_v45 = vpop.f32.mrb[11].mxu1  ;;  %v2822_v21 = vld [vmem:[#allocation28_spill] sm:$0xff]  ;;  %v2824_v25 = vld [vmem:[#allocation29_spill] sm:$0xff] }
 0x1a8   :  { %v690_v46 = vadd.f32 %v2457_v13, %v662_v27  ;;  %v2823_v27 = vld [vmem:[#allocation41_spill] sm:$0xff]  ;;  %v2826_v45 = vld [vmem:[#allocation30_spill] sm:$0xff] }
 0x1a9   :  { %1767 = vtanh.f32 %v689_v44  ;;  %v2825_v44 = vld [vmem:[#allocation42_spill] sm:$0xff] }
 0x1aa   :  { %v1597_v48 = vmul.f32 -1.442695, %v690_v46  ;;  %v2827_v46 = vld [vmem:[#allocation43_spill] sm:$0xff] }
 0x1ac   :  { %1769 = vpow2.f32 %v1597_v48 }
 0x1b3   :  { %v1768_v19 = vpop.eup %1767 }
 0x1b4   :  { %v711_v36 = vmul.f32 %v1768_v19, %v1766_v43  ;;  %v717_v19 = vld [vmem:[#allocation3 + $0x4] sm:$0xf]  ;;  %v2830_v43 = vld [vmem:[#allocation32_spill] sm:$0xff] }
 0x1b6   :  { %v1770_v49 = vpop.eup %1769  ;;  %v2461_v29 = vadd.f32 %v711_v36, %v710_v52  ;;  %v2831_v52 = vld [vmem:[#allocation45_spill] sm:$0xff] }
 0x1b7   :  { %v707_v17 = vadd.f32 1.0, %v1770_v49  ;;  %v2832_v36 = vld [vmem:[#allocation33_spill] sm:$0xff]  ;;  %v2833_v49 = vld [vmem:[#allocation46_spill] sm:$0xff] }
 0x1b8   :  { %1771 = vtanh.f32 %v2461_v29 }
 0x1b9   :  { %1773 = vrcp.f32 %v707_v17  ;;  %v2834_v17 = vld [vmem:[#allocation34_spill] sm:$0xff] }
 0x1c2   :  { %v1772_v50 = vpop.eup %1771 }
 0x1c3   :  { %v1774_v42 = vpop.eup %1773 }
 0x1c4   :  { %v2464_v23 = vmul.f32 %v1774_v42, %v1772_v50  ;;  %v2835_v50 = vld [vmem:[#allocation47_spill] sm:$0xff] }
 0x1c5   :  { %v2836_v42 = vld [vmem:[#allocation35_spill] sm:$0xff] }
 0x1c6   :  { %2821 = vst [vmem:[#allocation55_spill] sm:$0xff] %v2464_v23  ;;  %v718_v48 = vpack.c.bf16 %v2464_v23, %v2464_v23  ;;  %v2839_v23 = vld [vmem:[#allocation49_spill] sm:$0xff] }
 0x1c8   :  { %752 = vmatmul.mubr.bf16.vlgmr.msra.gmra.mrb[4].mxu0 %v718_v48  ;;  %793 = vmatmul.mubr.bf16.vlgmr.msra.gmra.mrb[12].mxu1 %v718_v48  ;;  %v2837_v48 = vld [vmem:[#allocation48_spill] sm:$0xff] }
 0x1c9   :  { %802 = vmatpush1.bf16.msra.mxu0 %v2209_v4  ;;  %843 = vmatpush1.bf16.msra.mxu1 %v2368_v53 }
 0x1ca   :  { %803 = vmatprep.subr.bf16.mxu0 %v2216_v6  ;;  %844 = vmatprep.subr.bf16.mxu1 %v2371_v54 }
 0x1cb   :  { %833 = vmatprep.mubr.bf16.mxu0 %v2817_v31  ;;  %874 = vmatprep.mubr.bf16.mxu1 %v2817_v31 }
 0x1cd   :  { %804 = vmatpush1.bf16.msra.mxu0 %v2221_v8  ;;  %845 = vmatpush1.bf16.msra.mxu1 %v2376_v55 }
 0x1ce   :  { %805 = vmatprep.subr.bf16.mxu0 %v2226_v10  ;;  %846 = vmatprep.subr.bf16.mxu1 %v2380_v56 }
 0x1d1   :  { %806 = vmatpush1.bf16.msra.mxu0 %v2230_v12  ;;  %847 = vmatpush1.bf16.msra.mxu1 %v2383_v57 }
 0x1d2   :  { %807 = vmatprep.subr.bf16.mxu0 %v2238_v14  ;;  %848 = vmatprep.subr.bf16.mxu1 %v2386_v58 }
 0x1d5   :  { %808 = vmatpush1.bf16.msra.mxu0 %v2244_v16  ;;  %849 = vmatpush1.bf16.msra.mxu1 %v2389_v59 }
 0x1d6   :  { %809 = vmatprep.subr.bf16.mxu0 %v2250_v18  ;;  %850 = vmatprep.subr.bf16.mxu1 %v2392_v60 }
 0x1d9   :  { %810 = vmatpush1.bf16.msra.mxu0 %v2254_v20  ;;  %851 = vmatpush1.bf16.msra.mxu1 %v2395_v61 }
 0x1da   :  { %811 = vmatprep.subr.bf16.mxu0 %v2262_v22  ;;  %852 = vmatprep.subr.bf16.mxu1 %v2398_v62 }
 0x1dd   :  { %812 = vmatpush1.bf16.msra.mxu0 %v2268_v24  ;;  %853 = vmatpush1.bf16.msra.mxu1 %v2401_v63 }
 0x1de   :  { %813 = vmatprep.subr.bf16.mxu0 %v2274_v26  ;;  %854 = vmatprep.subr.bf16.mxu1 %v2404_v33 }
 0x1e1   :  { %814 = vmatpush1.bf16.msra.mxu0 %v2280_v28  ;;  %855 = vmatpush1.bf16.msra.mxu1 %v2407_v35 }
 0x1e2   :  { %815 = vmatprep.subr.bf16.mxu0 %v2286_v30  ;;  %856 = vmatprep.subr.bf16.mxu1 %v2410_v0 }
 0x1e5   :  { %816 = vmatpush1.bf16.msra.mxu0 %v2292_v32  ;;  %857 = vmatpush1.bf16.msra.mxu1 %v2413_v2 }
 0x1e6   :  { %915 = vmatprep.subr.bf16.mxu0 %v2202_v1  ;;  %956 = vmatprep.subr.bf16.mxu1 %v2296_v34 }
 0x1e8   :  { %834 = vmatmul.mubr.bf16.vlgmr.msra.gmra.mrb[8].mxu0 %v717_v19  ;;  %875 = vmatmul.mubr.bf16.vlgmr.msra.gmra.mrb[16].mxu1 %v717_v19  ;;  %v2838_v19 = vld [vmem:[#allocation36_spill] sm:$0xff] }
 0x1e9   :  { %916 = vmatpush1.bf16.msra.mxu0 %v2207_v3  ;;  %957 = vmatpush1.bf16.msra.mxu1 %v2302_v37 }
 0x1ea   :  { %917 = vmatprep.subr.bf16.mxu0 %v2212_v5  ;;  %958 = vmatprep.subr.bf16.mxu1 %v2305_v38 }
 0x1eb   :  { %947 = vmatprep.mubr.bf16.mxu0 %v2817_v31  ;;  %988 = vmatprep.mubr.bf16.mxu1 %v2817_v31 }
 0x1ed   :  { %918 = vmatpush1.bf16.msra.mxu0 %v2218_v7  ;;  %959 = vmatpush1.bf16.msra.mxu1 %v2310_v39  ;;  %v2845_v39 = vld [vmem:[#allocation53_spill] sm:$0xff] }
 0x1ee   :  { %919 = vmatprep.subr.bf16.mxu0 %v2224_v9  ;;  %960 = vmatprep.subr.bf16.mxu1 %v2314_v40 }
 0x1f1   :  { %920 = vmatpush1.bf16.msra.mxu0 %v2228_v11  ;;  %961 = vmatpush1.bf16.msra.mxu1 %v2320_v41  ;;  %v2844_v11 = vld [vmem:[#allocation54_spill] sm:$0xff] }
 0x1f2   :  { %921 = vmatprep.subr.bf16.mxu0 %v2822_v21  ;;  %962 = vmatprep.subr.bf16.mxu1 %v2823_v27 }
 0x1f5   :  { %922 = vmatpush1.bf16.msra.mxu0 %v2824_v25  ;;  %963 = vmatpush1.bf16.msra.mxu1 %v2825_v44 }
 0x1f6   :  { %923 = vmatprep.subr.bf16.mxu0 %v2826_v45  ;;  %964 = vmatprep.subr.bf16.mxu1 %v2827_v46 }
 0x1f9   :  { %924 = vmatpush1.bf16.msra.mxu0 %v2828_v47  ;;  %965 = vmatpush1.bf16.msra.mxu1 %v2829_v51  ;;  %v2840_v51 = vld [vmem:[#allocation37_spill] sm:$0xff] }
 0x1fa   :  { %925 = vmatprep.subr.bf16.mxu0 %v2830_v43  ;;  %966 = vmatprep.subr.bf16.mxu1 %v2831_v52  ;;  %v2841_v43 = vld [vmem:[#allocation50_spill] sm:$0xff]  ;;  %v2842_v52 = vld [vmem:[#allocation24_spill] sm:$0xff] }
 0x1fd   :  { %926 = vmatpush1.bf16.msra.mxu0 %v2832_v36  ;;  %967 = vmatpush1.bf16.msra.mxu1 %v2833_v49  ;;  %v2843_v36 = vld [vmem:[#allocation51_spill] sm:$0xff] }
 0x1fe   :  { %927 = vmatprep.subr.bf16.mxu0 %v2834_v17  ;;  %968 = vmatprep.subr.bf16.mxu1 %v2835_v50 }
 0x201   :  { %928 = vmatpush1.bf16.msra.mxu0 %v2836_v42  ;;  %969 = vmatpush1.bf16.msra.mxu1 %v2837_v48 }
 0x202   :  { %929 = vmatprep.subr.bf16.mxu0 %v2838_v19  ;;  %970 = vmatprep.subr.bf16.mxu1 %v2839_v23 }
 0x205   :  { %930 = vmatpush1.bf16.msra.mxu0 %v2840_v51  ;;  %971 = vmatpush1.bf16.msra.mxu1 %v2841_v43 }
 0x206   :  { %997 = vmatprep.subr.bf16.mxu0 %v2842_v52  ;;  %1038 = vmatprep.subr.bf16.mxu1 %v2843_v36 }
 0x29b   :  { %v753_v49 = vpop.f32.mrb[4].mxu0  ;;  %v794_v17 = vpop.f32.mrb[12].mxu1 }
 0x29c   :  { %v755_v47 = vpop.f32.mrb[5].mxu0  ;;  %v796_v50 = vpop.f32.mrb[13].mxu1 }
 0x29d   :  { %v757_v46 = vpop.f32.mrb[6].mxu0  ;;  %v798_v42 = vpop.f32.mrb[14].mxu1 }
 0x29e   :  { %v758_v45 = vpop.f32.mrb[7].mxu0  ;;  %v799_v48 = vpop.f32.mrb[15].mxu1 }
 0x2bb   :  { %v835_v44 = vpop.f32.mrb[8].mxu0  ;;  %v876_v19 = vpop.f32.mrb[16].mxu1 }
 0x2bc   :  { %v836_v25 = vadd.f32 %v835_v44, %v753_v49  ;;  %v877_v23 = vadd.f32 %v876_v19, %v794_v17  ;;  %v837_v27 = vpop.f32.mrb[9].mxu0  ;;  %v878_v51 = vpop.f32.mrb[17].mxu1  ;;  %v2863_v19 = vld [vmem:[#allocation46_spill] sm:$0xff] }
 0x2bd   :  { %v838_v21 = vadd.f32 %v837_v27, %v755_v47  ;;  %v879_v43 = vadd.f32 %v878_v51, %v796_v50  ;;  %v839_v41 = vpop.f32.mrb[10].mxu0  ;;  %v880_v52 = vpop.f32.mrb[18].mxu1 }
 0x2be   :  { %v883_v36 = vadd.f32 %v836_v25, %v2844_v11  ;;  %v840_v40 = vpop.f32.mrb[11].mxu0  ;;  %v881_v9 = vpop.f32.mrb[19].mxu1  ;;  %v885_v49 = vadd.f32 %v877_v23, %v2455_v15 }
 0x2bf   :  { %v884_v7 = vadd.f32 %v838_v21, %v2845_v39  ;;  %v886_v45 = vadd.f32 %v879_v43, %v2457_v13 }
 0x2c0   :  { %v1598_v46 = vmul.f32 -1.442695, %v883_v36 }
 0x2c1   :  { %v1599_v42 = vmul.f32 -1.442695, %v884_v7  ;;  %v1600_v44 = vmul.f32 -1.442695, %v886_v45  ;;  %v2866_v45 = vld [vmem:[#allocation35_spill] sm:$0xff] }
 0x2c2   :  { %1775 = vpow2.f32 %v1598_v46  ;;  %v2864_v46 = vld [vmem:[#allocation34_spill] sm:$0xff] }
 0x2c3   :  { %1777 = vpow2.f32 %v1599_v42  ;;  %v2865_v42 = vld [vmem:[#allocation47_spill] sm:$0xff] }
 0x2c4   :  { %1779 = vpow2.f32 %v1600_v44  ;;  %v2867_v44 = vld [vmem:[#allocation48_spill] sm:$0xff] }
 0x2c5   :  { %1781 = vtanh.f32 %v885_v49  ;;  %v2868_v49 = vld [vmem:[#allocation36_spill] sm:$0xff] }
 0x2cc   :  { %v1776_v17 = vpop.eup %1775 }
 0x2cd   :  { %v1778_v27 = vpop.eup %1777  ;;  %v890_v47 = vadd.f32 1.0, %v1776_v17  ;;  %v2869_v17 = vld [vmem:[#allocation49_spill] sm:$0xff] }
 0x2ce   :  { %v896_v41 = vadd.f32 1.0, %v1778_v27  ;;  %v1780_v9 = vpop.eup %1779  ;;  %v2870_v27 = vld [vmem:[#allocation37_spill] sm:$0xff] }
 0x2cf   :  { %1783 = vrcp.f32 %v890_v47  ;;  %v1782_v40 = vpop.eup %1781  ;;  %v903_v51 = vadd.f32 1.0, %v1780_v9  ;;  %v2871_v47 = vld [vmem:[#allocation50_spill] sm:$0xff]  ;;  %v2873_v9 = vld [vmem:[#allocation51_spill] sm:$0xff] }
 0x2d0   :  { %1785 = vrcp.f32 %v896_v41  ;;  %v2872_v41 = vld [vmem:[#allocation24_spill] sm:$0xff] }
 0x2d1   :  { %1787 = vrcp.f32 %v903_v51 }
 0x2d9   :  { %v1784_v21 = vpop.eup %1783 }
 0x2da   :  { %v1786_v25 = vpop.eup %1785  ;;  %v907_v7 = vmul.f32 %v1784_v21, %v1782_v40 }
 0x2db   :  { %v906_v52 = vmul.f32 %v1786_v25, %v2461_v29  ;;  %v1788_v23 = vpop.eup %1787  ;;  %v2862_v29 = vld [vmem:[#allocation33_spill] sm:$0xff] }
 0x2dd   :  { %v2541_v43 = vadd.f32 %v907_v7, %v906_v52 }
 0x2df   :  { %1789 = vtanh.f32 %v2541_v43 }
 0x2e9   :  { %v1790_v36 = vpop.eup %1789 }
 0x2ea   :  { %v2544_v50 = vmul.f32 %v1790_v36, %v1788_v23 }
 0x2ec   :  { %v914_v48 = vpack.c.bf16 %v2544_v50, %v2544_v50 }
 0x2ee   :  { %948 = vmatmul.mubr.bf16.vlgmr.msra.gmra.mrb[12].mxu0 %v914_v48  ;;  %989 = vmatmul.mubr.bf16.vlgmr.msra.gmra.mrb[20].mxu1 %v914_v48 }
 0x2ef   :  { %998 = vmatpush1.bf16.msra.mxu0 %v2209_v4  ;;  %1039 = vmatpush1.bf16.msra.mxu1 %v2368_v53  ;;  %v913_v4 = vld [vmem:[#allocation3 + $0x8] sm:$0xf] }
 0x2f0   :  { %999 = vmatprep.subr.bf16.mxu0 %v2216_v6  ;;  %1040 = vmatprep.subr.bf16.mxu1 %v2371_v54  ;;  %v2846_v6 = vld [vmem:[#allocation25_spill] sm:$0xff] }
 0x2f1   :  { %1029 = vmatprep.mubr.bf16.mxu0 %v2817_v31  ;;  %1070 = vmatprep.mubr.bf16.mxu1 %v2817_v31 }
 0x2f3   :  { %1000 = vmatpush1.bf16.msra.mxu0 %v2221_v8  ;;  %1041 = vmatpush1.bf16.msra.mxu1 %v2376_v55  ;;  %v2847_v8 = vld [vmem:[#allocation38_spill] sm:$0xff] }
 0x2f4   :  { %1001 = vmatprep.subr.bf16.mxu0 %v2226_v10  ;;  %1042 = vmatprep.subr.bf16.mxu1 %v2380_v56  ;;  %v2849_v10 = vld [vmem:[#allocation39_spill] sm:$0xff] }
 0x2f7   :  { %1002 = vmatpush1.bf16.msra.mxu0 %v2230_v12  ;;  %1043 = vmatpush1.bf16.msra.mxu1 %v2383_v57  ;;  %v2850_v12 = vld [vmem:[#allocation27_spill] sm:$0xff] }
 0x2f8   :  { %1003 = vmatprep.subr.bf16.mxu0 %v2238_v14  ;;  %1044 = vmatprep.subr.bf16.mxu1 %v2386_v58  ;;  %v2852_v14 = vld [vmem:[#allocation28_spill] sm:$0xff] }
 0x2fb   :  { %1004 = vmatpush1.bf16.msra.mxu0 %v2244_v16  ;;  %1045 = vmatpush1.bf16.msra.mxu1 %v2389_v59  ;;  %v2854_v16 = vld [vmem:[#allocation29_spill] sm:$0xff] }
 0x2fc   :  { %1005 = vmatprep.subr.bf16.mxu0 %v2250_v18  ;;  %1046 = vmatprep.subr.bf16.mxu1 %v2392_v60  ;;  %v2855_v18 = vld [vmem:[#allocation42_spill] sm:$0xff] }
 0x2ff   :  { %1006 = vmatpush1.bf16.msra.mxu0 %v2254_v20  ;;  %1047 = vmatpush1.bf16.msra.mxu1 %v2395_v61  ;;  %v2856_v20 = vld [vmem:[#allocation30_spill] sm:$0xff] }
 0x300   :  { %1007 = vmatprep.subr.bf16.mxu0 %v2262_v22  ;;  %1048 = vmatprep.subr.bf16.mxu1 %v2398_v62  ;;  %v2857_v22 = vld [vmem:[#allocation43_spill] sm:$0xff] }
 0x303   :  { %1008 = vmatpush1.bf16.msra.mxu0 %v2268_v24  ;;  %1049 = vmatpush1.bf16.msra.mxu1 %v2401_v63  ;;  %v2858_v24 = vld [vmem:[#allocation31_spill] sm:$0xff] }
 0x304   :  { %1009 = vmatprep.subr.bf16.mxu0 %v2274_v26  ;;  %1050 = vmatprep.subr.bf16.mxu1 %v2404_v33 }
 0x307   :  { %1010 = vmatpush1.bf16.msra.mxu0 %v2280_v28  ;;  %1051 = vmatpush1.bf16.msra.mxu1 %v2407_v35 }
 0x308   :  { %1011 = vmatprep.subr.bf16.mxu0 %v2286_v30  ;;  %1052 = vmatprep.subr.bf16.mxu1 %v2410_v0 }
 0x30b   :  { %1012 = vmatpush1.bf16.msra.mxu0 %v2292_v32  ;;  %1053 = vmatpush1.bf16.msra.mxu1 %v2413_v2 }
 0x30c   :  { %1111 = vmatprep.subr.bf16.mxu0 %v2202_v1  ;;  %1152 = vmatprep.subr.bf16.mxu1 %v2296_v34  ;;  %v2848_v1 = vld [vmem:[#allocation26_spill] sm:$0xff]  ;;  %v2859_v34 = vld [vmem:[#allocation44_spill] sm:$0xff] }
 0x30e   :  { %1030 = vmatmul.mubr.bf16.vlgmr.msra.gmra.mrb[16].mxu0 %v913_v4  ;;  %1071 = vmatmul.mubr.bf16.vlgmr.msra.gmra.mrb[24].mxu1 %v913_v4 }
 0x30f   :  { %1112 = vmatpush1.bf16.msra.mxu0 %v2207_v3  ;;  %1153 = vmatpush1.bf16.msra.mxu1 %v2302_v37  ;;  %v2851_v3 = vld [vmem:[#allocation40_spill] sm:$0xff] }
 0x310   :  { %1113 = vmatprep.subr.bf16.mxu0 %v2212_v5  ;;  %1154 = vmatprep.subr.bf16.mxu1 %v2305_v38  ;;  %v2853_v5 = vld [vmem:[#allocation41_spill] sm:$0xff]  ;;  %v2860_v37 = vld [vmem:[#allocation32_spill] sm:$0xff] }
 0x311   :  { %1143 = vmatprep.mubr.bf16.mxu0 %v2817_v31  ;;  %1184 = vmatprep.mubr.bf16.mxu1 %v2817_v31  ;;  %v2861_v38 = vld [vmem:[#allocation45_spill] sm:$0xff] }
 0x313   :  { %1114 = vmatpush1.bf16.msra.mxu0 %v2846_v6  ;;  %1155 = vmatpush1.bf16.msra.mxu1 %v2847_v8 }
 0x314   :  { %1115 = vmatprep.subr.bf16.mxu0 %v2848_v1  ;;  %1156 = vmatprep.subr.bf16.mxu1 %v2849_v10 }
 0x317   :  { %1116 = vmatpush1.bf16.msra.mxu0 %v2850_v12  ;;  %1157 = vmatpush1.bf16.msra.mxu1 %v2851_v3 }
 0x318   :  { %1117 = vmatprep.subr.bf16.mxu0 %v2852_v14  ;;  %1158 = vmatprep.subr.bf16.mxu1 %v2853_v5 }
 0x31b   :  { %1118 = vmatpush1.bf16.msra.mxu0 %v2854_v16  ;;  %1159 = vmatpush1.bf16.msra.mxu1 %v2855_v18 }
 0x31c   :  { %1119 = vmatprep.subr.bf16.mxu0 %v2856_v20  ;;  %1160 = vmatprep.subr.bf16.mxu1 %v2857_v22 }
 0x31f   :  { %1120 = vmatpush1.bf16.msra.mxu0 %v2858_v24  ;;  %1161 = vmatpush1.bf16.msra.mxu1 %v2859_v34 }
 0x320   :  { %1121 = vmatprep.subr.bf16.mxu0 %v2860_v37  ;;  %1162 = vmatprep.subr.bf16.mxu1 %v2861_v38 }
 0x323   :  { %1122 = vmatpush1.bf16.msra.mxu0 %v2862_v29  ;;  %1163 = vmatpush1.bf16.msra.mxu1 %v2863_v19 }
 0x324   :  { %1123 = vmatprep.subr.bf16.mxu0 %v2864_v46  ;;  %1164 = vmatprep.subr.bf16.mxu1 %v2865_v42 }
 0x327   :  { %1124 = vmatpush1.bf16.msra.mxu0 %v2866_v45  ;;  %1165 = vmatpush1.bf16.msra.mxu1 %v2867_v44 }
 0x328   :  { %1125 = vmatprep.subr.bf16.mxu0 %v2868_v49  ;;  %1166 = vmatprep.subr.bf16.mxu1 %v2869_v17 }
 0x32b   :  { %1126 = vmatpush1.bf16.msra.mxu0 %v2870_v27  ;;  %1167 = vmatpush1.bf16.msra.mxu1 %v2871_v47 }
 0x32c   :  { %1193 = vmatprep.subr.bf16.mxu0 %v2872_v41  ;;  %1234 = vmatprep.subr.bf16.mxu1 %v2873_v9 }
 0x3c1   :  { %v949_v40 = vpop.f32.mrb[12].mxu0  ;;  %v990_v21 = vpop.f32.mrb[20].mxu1 }
 0x3c2   :  { %v951_v25 = vpop.f32.mrb[13].mxu0  ;;  %v992_v7 = vpop.f32.mrb[21].mxu1 }
 0x3c3   :  { %v953_v51 = vpop.f32.mrb[14].mxu0  ;;  %v994_v52 = vpop.f32.mrb[22].mxu1 }
 0x3c4   :  { %v954_v23 = vpop.f32.mrb[15].mxu0  ;;  %v995_v36 = vpop.f32.mrb[23].mxu1  ;;  %v1823_v52 = vld [vmem:[#allocation9] ss:$16 sps:$4 sm:$0xff]  }
 0x3c5   :  { %v1824_v23 = vld [vmem:[#allocation9 + $0x24] ss:$16 sps:$4 sm:$0xff]  }
 0x3c6   :  { %v1826_v36 = vld [vmem:[#allocation9 + $0x44] ss:$16 sps:$4 sm:$0xff]  }
 0x3e1   :  { %v1031_v48 = vpop.f32.mrb[16].mxu0  ;;  %v1072_v4 = vpop.f32.mrb[24].mxu1 }
 0x3e2   :  { %v1032_v6 = vadd.f32 %v1031_v48, %v949_v40  ;;  %v1073_v8 = vadd.f32 %v1072_v4, %v990_v21  ;;  %v1033_v1 = vpop.f32.mrb[17].mxu0  ;;  %v1074_v10 = vpop.f32.mrb[25].mxu1  ;;  %v1827_v48 = vld [vmem:[#allocation9 + $0x40] ss:$16 sps:$4 sm:$0xff]   ;;  %v1830_v4 = vld [vmem:[#allocation9 + $0x84] ss:$16 sps:$4 sm:$0xff]  }
 0x3e3   :  { %v1034_v12 = vadd.f32 %v1033_v1, %v951_v25  ;;  %v1075_v3 = vadd.f32 %v1074_v10, %v992_v7  ;;  %v1035_v14 = vpop.f32.mrb[18].mxu0  ;;  %v1076_v5 = vpop.f32.mrb[26].mxu1  ;;  %v1756_v1 = vld [vmem:[#allocation12 + $0x70] ss:$8 sps:$4 sm:$0xff]   ;;  %v2874_v10 = vld [vmem:[#allocation55_spill] sm:$0xff] }
 0x3e4   :  { %v1079_v16 = vadd.f32 %v1032_v6, %v2844_v11  ;;  %v1036_v18 = vpop.f32.mrb[19].mxu0  ;;  %v1077_v20 = vpop.f32.mrb[27].mxu1  ;;  %v1081_v29 = vadd.f32 %v1073_v8, %v2455_v15  ;;  %v1753_v6 = vld [vmem:[#allocation12 + $0x60] ss:$8 sps:$4 sm:$0xff]   ;;  %v1758_v8 = vld [vmem:[#allocation12 + $0x74] ss:$8 sps:$4 sm:$0xff]  }
 0x3e5   :  { %v1080_v22 = vadd.f32 %v1034_v12, %v2845_v39  ;;  %v1082_v37 = vadd.f32 %v1075_v3, %v2457_v13  ;;  %v1310_v12 = vpack.c.bf16 %v2544_v50, %v2874_v10 }
 0x3e6   :  { %v1601_v24 = vmul.f32 -1.442695, %v1079_v16 }
 0x3e7   :  { %v1602_v34 = vmul.f32 -1.442695, %v1080_v22  ;;  %v1603_v38 = vmul.f32 -1.442695, %v1082_v37 }
 0x3e8   :  { %1791 = vpow2.f32 %v1601_v24 }
 0x3e9   :  { %1793 = vpow2.f32 %v1602_v34 }
 0x3ea   :  { %1795 = vpow2.f32 %v1603_v38 }
 0x3eb   :  { %1797 = vtanh.f32 %v1081_v29 }
 0x3f2   :  { %v1792_v19 = vpop.eup %1791 }
 0x3f3   :  { %v1794_v46 = vpop.eup %1793  ;;  %v1086_v42 = vadd.f32 1.0, %v1792_v19 }
 0x3f4   :  { %v1092_v45 = vadd.f32 1.0, %v1794_v46  ;;  %v1796_v44 = vpop.eup %1795 }
 0x3f5   :  { %1799 = vrcp.f32 %v1086_v42  ;;  %v1798_v49 = vpop.eup %1797  ;;  %v1099_v41 = vadd.f32 1.0, %v1796_v44 }
 0x3f6   :  { %1801 = vrcp.f32 %v1092_v45 }
 0x3f7   :  { %1803 = vrcp.f32 %v1099_v41 }
 0x3ff   :  { %v1800_v17 = vpop.eup %1799 }
 0x400   :  { %v1802_v27 = vpop.eup %1801  ;;  %v1103_v47 = vmul.f32 %v1800_v17, %v1798_v49 }
 0x401   :  { %v1102_v9 = vmul.f32 %v1802_v27, %v2541_v43  ;;  %v1804_v21 = vpop.eup %1803  ;;  %v1825_v43 = vld [vmem:[#allocation9 + $0x20] ss:$16 sps:$4 sm:$0xff]  }
 0x403   :  { %v2621_v40 = vadd.f32 %v1103_v47, %v1102_v9 }
 0x405   :  { %1805 = vtanh.f32 %v2621_v40 }
 0x40f   :  { %v1806_v25 = vpop.eup %1805 }
 0x410   :  { %v2624_v7 = vmul.f32 %v1806_v25, %v1804_v21 }
 0x412   :  { %v1110_v51 = vpack.c.bf16 %v2624_v7, %v2624_v7 }
 0x414   :  { %1144 = vmatmul.mubr.bf16.vlgmr.msra.gmra.mrb[20].mxu0 %v1110_v51  ;;  %1185 = vmatmul.mubr.bf16.vlgmr.msra.gmra.mrb[28].mxu1 %v1110_v51 }
 0x415   :  { %1194 = vmatpush1.bf16.msra.mxu0 %v1823_v52  ;;  %1235 = vmatpush1.bf16.msra.mxu1 %v2368_v53  ;;  %v1828_v53 = vld [vmem:[#allocation9 + $0x64] ss:$16 sps:$4 sm:$0xff]  }
 0x416   :  { %1195 = vmatprep.subr.bf16.mxu0 %v1824_v23  ;;  %1236 = vmatprep.subr.bf16.mxu1 %v2371_v54  ;;  %v1829_v54 = vld [vmem:[#allocation9 + $0x60] ss:$16 sps:$4 sm:$0xff]  }
 0x417   :  { %1225 = vmatprep.mubr.bf16.mxu0 %v2817_v31  ;;  %1266 = vmatprep.mubr.bf16.mxu1 %v2817_v31 }
 0x419   :  { %1196 = vmatpush1.bf16.msra.mxu0 %v1825_v43  ;;  %1237 = vmatpush1.bf16.msra.mxu1 %v2376_v55  ;;  %v1831_v55 = vld [vmem:[#allocation9 + $0x80] ss:$16 sps:$4 sm:$0xff]  }
 0x41a   :  { %1197 = vmatprep.subr.bf16.mxu0 %v1826_v36  ;;  %1238 = vmatprep.subr.bf16.mxu1 %v2380_v56  ;;  %v1832_v56 = vld [vmem:[#allocation9 + $0xa4] ss:$16 sps:$4 sm:$0xff]  }
 0x41d   :  { %1198 = vmatpush1.bf16.msra.mxu0 %v1827_v48  ;;  %1239 = vmatpush1.bf16.msra.mxu1 %v2383_v57  ;;  %v1833_v57 = vld [vmem:[#allocation9 + $0xa0] ss:$16 sps:$4 sm:$0xff]  }
 0x41e   :  { %1199 = vmatprep.subr.bf16.mxu0 %v1828_v53  ;;  %1240 = vmatprep.subr.bf16.mxu1 %v2386_v58  ;;  %v1737_v58 = vld [vmem:[#allocation12 + $0x4] ss:$8 sps:$4 sm:$0xff]   ;;  %v2875_v48 = vld [vmem:[#allocation52_spill] sm:$0xff] }
 0x41f   :  { %v2876_v53 = vsub.s32 0, %v2875_v48 }
 0x421   :  { %1200 = vmatpush1.bf16.msra.mxu0 %v1829_v54  ;;  %1241 = vmatpush1.bf16.msra.mxu1 %v2389_v59  ;;  %v1109_v59 = vld [vmem:[#allocation3 + $0xc] sm:$0xf] }
 0x422   :  { %1201 = vmatprep.subr.bf16.mxu0 %v1830_v4  ;;  %1242 = vmatprep.subr.bf16.mxu1 %v2392_v60  ;;  %v1735_v60 = vld [vmem:[#allocation12] ss:$8 sps:$4 sm:$0xff]  }
 0x425   :  { %1202 = vmatpush1.bf16.msra.mxu0 %v1831_v55  ;;  %1243 = vmatpush1.bf16.msra.mxu1 %v2395_v61  ;;  %v1740_v61 = vld [vmem:[#allocation12 + $0x14] ss:$8 sps:$4 sm:$0xff]  }
 0x426   :  { %1203 = vmatprep.subr.bf16.mxu0 %v1832_v56  ;;  %1244 = vmatprep.subr.bf16.mxu1 %v2398_v62  ;;  %v1747_v62 = vld [vmem:[#allocation12 + $0x40] ss:$8 sps:$4 sm:$0xff]  }
 0x429   :  { %1204 = vmatpush1.bf16.msra.mxu0 %v1833_v57  ;;  %1245 = vmatpush1.bf16.msra.mxu1 %v2401_v63  ;;  %v1752_v63 = vld [vmem:[#allocation12 + $0x54] ss:$8 sps:$4 sm:$0xff]  }
 0x42a   :  { %1205 = vmatprep.subr.bf16.mxu0 %v2274_v26  ;;  %1246 = vmatprep.subr.bf16.mxu1 %v2404_v33  ;;  %v1738_v26 = vld [vmem:[#allocation12 + $0x10] ss:$8 sps:$4 sm:$0xff]  }
 0x42b   :  { %v1750_v33 = vld [vmem:[#allocation12 + $0x50] ss:$8 sps:$4 sm:$0xff]  }
 0x42d   :  { %1206 = vmatpush1.bf16.msra.mxu0 %v2280_v28  ;;  %1247 = vmatpush1.bf16.msra.mxu1 %v2407_v35  ;;  %v1743_v28 = vld [vmem:[#allocation12 + $0x24] ss:$8 sps:$4 sm:$0xff]  }
 0x42e   :  { %1207 = vmatprep.subr.bf16.mxu0 %v2286_v30  ;;  %1248 = vmatprep.subr.bf16.mxu1 %v2410_v0  ;;  %v1741_v30 = vld [vmem:[#allocation12 + $0x20] ss:$8 sps:$4 sm:$0xff]   ;;  %v1746_v0 = vld [vmem:[#allocation12 + $0x34] ss:$8 sps:$4 sm:$0xff]   ;;  %v1755_v35 = vld [vmem:[#allocation12 + $0x64] ss:$8 sps:$4 sm:$0xff]  }
 0x431   :  { %1208 = vmatpush1.bf16.msra.mxu0 %v2292_v32  ;;  %1249 = vmatpush1.bf16.msra.mxu1 %v2413_v2  ;;  %v1744_v32 = vld [vmem:[#allocation12 + $0x30] ss:$8 sps:$4 sm:$0xff]   ;;  %v1749_v2 = vld [vmem:[#allocation12 + $0x44] ss:$8 sps:$4 sm:$0xff]  }
 0x432   :  { %1420 = vmatprep.subr.bf16.mxu0 %v1737_v58 }
 0x434   :  { %1226 = vmatmul.mubr.bf16.vlgmr.msra.gmra.mrb[24].mxu0 %v1109_v59  ;;  %1267 = vmatmul.mubr.bf16.vlgmr.msra.gmra.mrb[32].mxu1 %v1109_v59 }
 0x435   :  { %1421 = vmatpush1.bf16.msra.mxu0 %v1735_v60  ;;  %1452 = vmatprep.mubr.bf16.mxu0 %v2817_v31 }
 0x436   :  { %1422 = vmatprep.subr.bf16.mxu0 %v1740_v61 }
 0x439   :  { %1423 = vmatpush1.bf16.msra.mxu0 %v1738_v26 }
 0x43a   :  { %1424 = vmatprep.subr.bf16.mxu0 %v1743_v28 }
 0x43d   :  { %1425 = vmatpush1.bf16.msra.mxu0 %v1741_v30 }
 0x43e   :  { %1426 = vmatprep.subr.bf16.mxu0 %v1746_v0 }
 0x441   :  { %1427 = vmatpush1.bf16.msra.mxu0 %v1744_v32 }
 0x442   :  { %1428 = vmatprep.subr.bf16.mxu0 %v1749_v2 }
 0x445   :  { %1429 = vmatpush1.bf16.msra.mxu0 %v1747_v62 }
 0x446   :  { %1430 = vmatprep.subr.bf16.mxu0 %v1752_v63 }
 0x449   :  { %1431 = vmatpush1.bf16.msra.mxu0 %v1750_v33 }
 0x44a   :  { %1432 = vmatprep.subr.bf16.mxu0 %v1755_v35 }
 0x44d   :  { %1433 = vmatpush1.bf16.msra.mxu0 %v1753_v6 }
 0x44e   :  { %1434 = vmatprep.subr.bf16.mxu0 %v1758_v8 }
 0x451   :  { %1435 = vmatpush1.bf16.msra.mxu0 %v1756_v1 }
 0x454   :  { %1453 = vmatmul.mubr.bf16.vlgmr.msra.gmra.mrb[28].mxu0 %v1310_v12 }
 0x455   :  { %1462 = vmatprep.mubr.bf16.mxu0 %v2817_v31 }
 0x4e7   :  { %v1145_v3 = vpop.f32.mrb[20].mxu0  ;;  %v1186_v14 = vpop.f32.mrb[28].mxu1 }
 0x4e8   :  { %v1147_v5 = vpop.f32.mrb[21].mxu0  ;;  %v1188_v16 = vpop.f32.mrb[29].mxu1 }
 0x4e9   :  { %v1149_v18 = vpop.f32.mrb[22].mxu0  ;;  %v1190_v20 = vpop.f32.mrb[30].mxu1 }
 0x4ea   :  { %v1150_v22 = vpop.f32.mrb[23].mxu0  ;;  %v1191_v24 = vpop.f32.mrb[31].mxu1 }
 0x507   :  { %v1227_v34 = vpop.f32.mrb[24].mxu0  ;;  %v1268_v37 = vpop.f32.mrb[32].mxu1 }
 0x508   :  { %v1228_v38 = vadd.f32 %v1227_v34, %v1145_v3  ;;  %v1269_v29 = vadd.f32 %v1268_v37, %v1186_v14  ;;  %v1229_v19 = vpop.f32.mrb[25].mxu0  ;;  %v1270_v46 = vpop.f32.mrb[33].mxu1 }
 0x509   :  { %v1230_v42 = vadd.f32 %v1229_v19, %v1147_v5  ;;  %v1271_v45 = vadd.f32 %v1270_v46, %v1188_v16  ;;  %v1231_v50 = vpop.f32.mrb[26].mxu0  ;;  %v1272_v44 = vpop.f32.mrb[34].mxu1 }
 0x50a   :  { %v1275_v31 = vadd.f32 %v1228_v38, %v2844_v11  ;;  %v1232_v49 = vpop.f32.mrb[27].mxu0  ;;  %v1273_v17 = vpop.f32.mrb[35].mxu1  ;;  %v1277_v25 = vadd.f32 %v1269_v29, %v2455_v15  ;;  %v1328_v11 = vld [vmem:[%s2724_s7] sm:$0x3]  ;;  %v2877_v15 = vsub.s32 1, %v2875_v48  ;;  %s2057_s7 = smov [#allocation15]  }
 0x50b   :  { %v1276_v27 = vadd.f32 %v1230_v42, %v2845_v39  ;;  %v1278_v9 = vadd.f32 %v1271_v45, %v2457_v13  ;;  %v2662_v13 = vrot.slane %v1328_v11, %v2876_v53  ;;  %s1502_s3 = sshll.u32 %s2057_s7, 4  ;;  %s1503_s3 = int_to_ptr.vmem [resolvable:$true] %s1502_s3 }
 0x50c   :  { %v1604_v47 = vmul.f32 -1.442695, %v1275_v31  ;;  %v2666_v4 = vrot.slane %v1328_v11, %v2877_v15  ;;  %s1966_s16 = scalar_lea.vmem %s1503_s3, 128  ;;  %p1971_p7 = scmp.lt.s32.totalorder %s1503_s3, %s1503_s3 }
 0x50d   :  { %v1605_v41 = vmul.f32 -1.442695, %v1276_v27  ;;  %v1606_v21 = vmul.f32 -1.442695, %v1278_v9  ;;  %p1967_p6 = scmp.ne.s32.totalorder %s1503_s3, %s1966_s16  ;;  %p1972_p8 = scmp.lt.s32.totalorder %s1966_s16, %s1966_s16 }
 0x50e   :  { %1807 = vpow2.f32 %v1604_v47 }
 0x50f   :  { %1809 = vpow2.f32 %v1605_v41  ;;  %p1973_p9 = por %p1972_p8, %p1971_p7 }
 0x510   :  { %1811 = vpow2.f32 %v1606_v21 }
 0x511   :  { %1813 = vtanh.f32 %v1277_v25  ;;  %p1974_p10 = pnand %p1973_p9, %p1967_p6 }
 0x518   :  { %v1808_v51 = vpop.eup %1807 }
 0x519   :  { %v1810_v52 = vpop.eup %1809  ;;  %v1282_v23 = vadd.f32 1.0, %v1808_v51 }
 0x51a   :  { %v1288_v43 = vadd.f32 1.0, %v1810_v52  ;;  %v1812_v39 = vpop.eup %1811 }
 0x51b   :  { %1815 = vrcp.f32 %v1282_v23  ;;  %v1814_v36 = vpop.eup %1813  ;;  %v1295_v57 = vadd.f32 1.0, %v1812_v39 }
 0x51c   :  { %1817 = vrcp.f32 %v1288_v43 }
 0x51d   :  { %1819 = vrcp.f32 %v1295_v57 }
 0x525   :  { %v1816_v54 = vpop.eup %1815 }
 0x526   :  { %v1818_v55 = vpop.eup %1817  ;;  %v1299_v56 = vmul.f32 %v1816_v54, %v1814_v36 }
 0x527   :  { %v1298_v58 = vmul.f32 %v1818_v55, %v2621_v40  ;;  %v1454_v59 = vpop.f32.mrb[28].mxu0  ;;  %v1820_v40 = vpop.eup %1819 }
 0x528   :  { %v1455_v60 = vadd.f32 %v1454_v59, %v2662_v13  ;;  %v1456_v61 = vpop.f32.mrb[29].mxu0 }
 0x529   :  { %v1457_v26 = vadd.f32 %v1456_v61, %v2666_v4  ;;  %v1458_v28 = vpop.f32.mrb[30].mxu0  ;;  %v1300_v30 = vadd.f32 %v1299_v56, %v1298_v58 }
 0x52a   :  { %1473 = vst [vmem:[#allocation14] sm:$0xff] %v1455_v60  ;;  %v1459_v0 = vadd.f32 %v1458_v28, %v2662_v13  ;;  %v1460_v32 = vpop.f32.mrb[31].mxu0 }
 0x52b   :  { %1474 = vst [vmem:[#allocation14 + $0x8] sm:$0xff] %v1457_v26  ;;  %v1461_v2 = vadd.f32 %v1460_v32, %v2666_v4  ;;  %1821 = vtanh.f32 %v1300_v30  ;;  %1305 = vst [vmem:[#allocation17] sm:$0xff] %v1300_v30 }
 0x52c   :  { %1476 = vst [vmem:[#allocation14 + $0x10] sm:$0xff] %v1459_v0 }
 0x52d   :  { %1477 = vst [vmem:[#allocation14 + $0x18] sm:$0xff] %v1461_v2 }
 0x535   :  { %v1822_v62 = vpop.eup %1821 }
 0x536   :  { %v1302_v63 = vmul.f32 %v1822_v62, %v1820_v40 }
 0x538   :  { %v1311_v33 = vpack.c.bf16 %v1302_v63, %v2624_v7  ;;  %1304 = vst [vmem:[#allocation15] sm:$0xff] %v1302_v63 }
 0x53a   :  { %1463 = vmatmul.mubr.bf16.gmra.mrb[32].mxu0 %v1311_v33 }
 0x53b   :  { %1977 = shalt.err (!%p1974_p10)
}
 0x53c   :  { %s1978_s11 = scalar_lea.hbm %s2726_s9, 128 }
 0x53d   :  { %p1979_p11 = scmp.ne.s32.totalorder %s2726_s9, %s1978_s11  ;;  %p1982_p12 = scmp.lt.u32.totalorder %s1978_s11, %s2726_s9 }
 0x53f   :  { %p1984_p13 = pnand %p1982_p12, %p1979_p11 }
 0x541   :  { %1987 = shalt.err (!%p1984_p13)
}
 0x542   :  { %1505 = dma.vmem_to_hbm [thread:$0]  %s1503_s3, 128, %s2726_s9, [#allocation16]  }
 0x543   :  { %s2058_s21 = smov [#allocation17]  }
 0x544   :  { %s1512_s22 = sshll.u32 %s2058_s21, 4  ;;  %s1513_s22 = int_to_ptr.vmem [resolvable:$true] %s1512_s22 }
 0x545   :  { %s1988_s23 = scalar_lea.vmem %s1513_s22, 128  ;;  %p1993_p1 = scmp.lt.s32.totalorder %s1513_s22, %s1513_s22 }
 0x546   :  { %p1989_p0 = scmp.ne.s32.totalorder %s1513_s22, %s1988_s23  ;;  %p1994_p2 = scmp.lt.s32.totalorder %s1988_s23, %s1988_s23 }
 0x548   :  { %p1995_p3 = por %p1994_p2, %p1993_p1 }
 0x54a   :  { %p1996_p4 = pnand %p1995_p3, %p1989_p0 }
 0x54c   :  { %1999 = shalt.err (!%p1996_p4)
}
 0x54d   :  { %s2000_s20 = scalar_lea.hbm %s2727_s10, 128 }
 0x54e   :  { %p2001_p5 = scmp.ne.s32.totalorder %s2727_s10, %s2000_s20  ;;  %p2004_p6 = scmp.lt.u32.totalorder %s2000_s20, %s2727_s10 }
 0x550   :  { %p2006_p7 = pnand %p2004_p6, %p2001_p5 }
 0x552   :  { %2009 = shalt.err (!%p2006_p7)
}
 0x553   :  { %1515 = dma.vmem_to_hbm [thread:$0]  %s1513_s22, 128, %s2727_s10, [#allocation16]  }
 0x554   :  { %s2059_s27 = smov [#allocation14]  }
 0x555   :  { %s1489_s5 = sshll.u32 %s2059_s27, 4  ;;  %s1490_s5 = int_to_ptr.vmem [resolvable:$true] %s1489_s5 }
 0x556   :  { %s2010_s10 = scalar_lea.vmem %s1490_s5, 1024  ;;  %p2015_p9 = scmp.lt.s32.totalorder %s1490_s5, %s1490_s5 }
 0x557   :  { %p2011_p8 = scmp.ne.s32.totalorder %s1490_s5, %s2010_s10  ;;  %p2016_p10 = scmp.lt.s32.totalorder %s2010_s10, %s2010_s10 }
 0x559   :  { %p2017_p11 = por %p2016_p10, %p2015_p9 }
 0x55b   :  { %p2018_p12 = pnand %p2017_p11, %p2011_p8 }
 0x60d   :  { %v1464_v7 = vpop.f32.mrb[32].mxu0 }
 0x60e   :  { %v1465_v35 = vadd.f32 %v1464_v7, %v2662_v13  ;;  %v1466_v6 = vpop.f32.mrb[33].mxu0 }
 0x60f   :  { %v1467_v8 = vadd.f32 %v1466_v6, %v2666_v4  ;;  %v1468_v1 = vpop.f32.mrb[34].mxu0 }
 0x610   :  { %1479 = vst [vmem:[#allocation14 + $0x20] sm:$0xff] %v1465_v35  ;;  %v1469_v10 = vadd.f32 %v1468_v1, %v2662_v13  ;;  %v1470_v12 = vpop.f32.mrb[35].mxu0 }
 0x611   :  { %1480 = vst [vmem:[#allocation14 + $0x28] sm:$0xff] %v1467_v8  ;;  %v1471_v3 = vadd.f32 %v1470_v12, %v2666_v4 }
 0x612   :  { %1482 = vst [vmem:[#allocation14 + $0x30] sm:$0xff] %v1469_v10 }
 0x613   :  { %1483 = vst [vmem:[#allocation14 + $0x38] sm:$0xff] %v1471_v3 }
 0x614   :  { %2021 = shalt.err (!%p2018_p12)
}
 0x615   :  { %s2022_s3 = scalar_lea.hbm %s2725_s8, 1024 }
 0x616   :  { %p2023_p13 = scmp.ne.s32.totalorder %s2725_s8, %s2022_s3  ;;  %p2026_p0 = scmp.lt.u32.totalorder %s2022_s3, %s2725_s8 }
 0x618   :  { %p2028_p1 = pnand %p2026_p0, %p2023_p13 }
 0x61a   :  { %2031 = shalt.err (!%p2028_p1)
}
 0x61b   :  { %1495 = dma.vmem_to_hbm [thread:$0]  %s1490_s5, 1024, %s2725_s8, [#allocation5], %s2046_s1, %s2046_s1, %s2047_s14  }
 0x61c   :  { %2040 = dma.done.wait [#allocation5], 1024  }
 0x61d   :  { %2041 = vsyncadd [#allocation5], 4294966272 }
 0x61e   :  { %2042 = dma.done.wait [#allocation16], 256  }
 0x61f   :  { %2043 = vsyncadd [#allocation16], 4294967040 }
 0x620   :  { %1525 = vsyncpa [#allocation4], 1 }
 0x621   :  { %1526 = vsyncpa [#allocation7], 1 }
 0x622   :  { %1527 = vsyncpa [#allocation10], 1 }
 0x623   :  { %1528 = vsyncpa [#allocation13], 1 }
 0x624   :  { %1529 = vsyncpa [#allocation5], 1 }
 0x625   :  { %1530 = vsyncpa [#allocation16], 1 }

</bundles_post_ra>
